<compile_context>
chip_gen: v5e
topology: v5e:2x2
jax: 0.10.0
libtpu: 0.0.40
codegen_flags: <defaults>
</compile_context>

<pallas_src>
import functools

import jax
import jax.numpy as jnp
import numpy as np
from jax import lax
from jax.experimental import pallas as pl
from jax.experimental.pallas import tpu as pltpu


# ----------------------------------------------------------------------------
# Pallas kernel: one grid step = one batch tile x one S-chunk of the
# attention-LSTM recurrence.  h/c are carried in VMEM scratch across S-chunks.
# ----------------------------------------------------------------------------
def _attn_decoder_kernel(
    hproj_ref,   # (BT, T, H)    i2h(batch_H) + b_h2h   (step-invariant, act dtype)
    bh_ref,      # (BT, T, D)    encoder features       (act dtype)
    ohg_ref,     # (SC, BT, 4H)  one-hot gate contribution + b_ih + b_hh (act dtype)
    wh2h_ref,    # (H, H)        W_h2h.T                (mm dtype)
    wscore_ref,  # (1, H)        score weight           (f32)
    wfused_ref,  # (D+H, 4H)     [W_ih[:, :D].T ; W_hh.T]  (mm dtype)
    wgen_ref,    # (H, Cp)       W_gen.T, class dim zero-padded to Cp (mm dtype)
    bgen_ref,    # (1, Cp)       f32
    out_ref,     # (SC, BT, Cp)  per-step logits (lane-dense), f32
    h_scr,       # (BT, H) f32   hidden-state carry (persists across grid steps)
    c_scr,       # (BT, H) f32   cell-state carry
):
    BT, T, H = hproj_ref.shape
    SC = ohg_ref.shape[0]
    f32 = jnp.float32

    # First S-chunk of each batch tile: reset the recurrent state.
    @pl.when(pl.program_id(1) == 0)
    def _():
        h_scr[...] = jnp.zeros_like(h_scr)
        c_scr[...] = jnp.zeros_like(c_scr)

    # Hoist resident loads out of the recurrence.  Elementwise math in f32
    # (v5e has no bf16 VPU/EUP); DMA / pipeline buffers stay in the narrow dtype.
    hproj = hproj_ref[...].astype(f32)             # (BT, T, H)
    bh = bh_ref[...].astype(f32)                   # (BT, T, D)
    w_h2h = wh2h_ref[...]                          # (H, H)
    w_score = wscore_ref[...].reshape(1, 1, H)     # (1,1,H) -> no VMEM-sized broadcast
    w_fused = wfused_ref[...]                      # (D+H, 4H)
    w_gen = wgen_ref[...]                          # (H, Cp)
    b_gen = bgen_ref[...]                          # (1, Cp)
    mm = w_fused.dtype

    def step(s, carry):
        h_prev, c_prev = carry                     # (BT, H) f32

        # ---- attention: e = score(tanh(i2h(H) + h2h(h))), softmax over T ----
        prev_proj = jnp.dot(h_prev.astype(mm), w_h2h,
                            preferred_element_type=f32)            # (BT, H)
        sc_t = jnp.tanh(hproj + prev_proj[:, None, :])             # (BT, T, H)
        e = jnp.sum(sc_t * w_score, axis=-1)                       # (BT, T)
        e_max = jnp.max(e, axis=-1, keepdims=True)
        p = jnp.exp(e - e_max)
        alpha = p * pl.reciprocal(jnp.sum(p, axis=-1, keepdims=True), approx=True)
        context = jnp.sum(alpha[:, :, None] * bh, axis=1)          # (BT, D)

        # ---- LSTM cell: ONE fused gate matmul over [context ; h_prev] ----
        x = jnp.concatenate([context, h_prev], axis=1).astype(mm)  # (BT, D+H)
        gates = (jnp.dot(x, w_fused, preferred_element_type=f32)
                 + ohg_ref[s].astype(f32))                          # (BT, 4H)
        i_g = jax.nn.sigmoid(gates[:, 0:H])
        f_g = jax.nn.sigmoid(gates[:, H:2 * H])
        g_g = jnp.tanh(gates[:, 2 * H:3 * H])
        o_g = jax.nn.sigmoid(gates[:, 3 * H:4 * H])
        c_new = f_g * c_prev + i_g * g_g
        h_new = o_g * jnp.tanh(c_new)

        # ---- generator (padded class dim -> lane-dense store) ----
        out_ref[s] = (jnp.dot(h_new.astype(mm), w_gen,
                              preferred_element_type=f32) + b_gen)
        return (h_new, c_new)

    h_new, c_new = lax.fori_loop(0, SC, step, (h_scr[...], c_scr[...]),
                                 unroll=min(4, SC))
    h_scr[...] = h_new
    c_scr[...] = c_new


def _vmem_limit_bytes(bt, T, D, H, sc, Cp, act_bytes, w_bytes):
    """Derive a VMEM budget from the actual block sizes (capped for v7x)."""
    G = 4 * H
    weights = (H * H + (D + H) * G + H * Cp) * w_bytes + (H + Cp) * 4
    blocks = 2 * ((bt * T * H + bt * T * D + sc * bt * G) * act_bytes
                  + sc * bt * Cp * 4)                    # double-buffered
    scratch = 2 * bt * H * 4
    in_kernel = bt * T * (2 * H + D) * 4                 # f32 copies + tanh temp
    est = weights + blocks + scratch + in_kernel
    return int(min(max(2 * est + (4 << 20), 32 << 20), 64 << 20))


# ----------------------------------------------------------------------------
# Wrapper: step-invariant precomputation + parameter re-layout + pallas_call.
# ----------------------------------------------------------------------------
@functools.partial(
    jax.jit,
    static_argnames=("num_classes", "batch_max_length", "batch_tile",
                     "s_chunk", "compute_dtype"))
def attention_forward(batch_H, text, params, *, num_classes, batch_max_length,
                      batch_tile=None, s_chunk=None,
                      compute_dtype=jnp.bfloat16):
    """Teacher-forced decoder forward built on AttentionCell semantics."""
    B, T, D = batch_H.shape
    H = params["W_h2h"].shape[0]
    C = num_classes
    S = batch_max_length + 1
    G = 4 * H
    Cp = ((C + 127) // 128) * 128                 # lane-dense padded class dim

    # batch tile: multiple of 8 (or the full batch).  On v7x choose it so that
    # B // bt >= 2 (and even) to keep both TensorCores busy.
    bt = B if batch_tile is None else batch_tile
    assert B % bt == 0 and (bt == B or bt % 8 == 0), \
        "batch_tile must divide B and be a multiple of 8 (or equal B)"

    sc = S if s_chunk is None else min(s_chunk, S)
    n_sc = -(-S // sc)
    S_pad = n_sc * sc

    f32 = jnp.float32
    cd = compute_dtype
    bH = batch_H.astype(f32)

    # -- step-invariant precompute (plain XLA, full-efficiency matmuls) --
    hproj = (jnp.einsum("btd,hd->bth", bH, params["W_i2h"].astype(f32))
             + params["b_h2h"].astype(f32)[None, None, :])            # (B,T,H)

    w_ih = params["W_ih"].astype(f32)                                  # (4H, D+C)
    w_ih_oh_t = w_ih[:, D:].T                                          # (C, 4H)
    tok = text[:, :S]                                                  # (B, S)
    valid = (tok >= 0) & (tok < C)                                     # match one_hot
    ohg = jnp.take(w_ih_oh_t, jnp.clip(tok, 0, C - 1), axis=0)         # (B,S,4H)
    ohg = jnp.where(valid[..., None], ohg, 0.0)
    ohg = ohg + (params["b_ih"] + params["b_hh"]).astype(f32)[None, None, :]
    ohg = jnp.transpose(ohg, (1, 0, 2))                                # (S,B,4H)
    if S_pad != S:
        ohg = jnp.pad(ohg, ((0, S_pad - S), (0, 0), (0, 0)))

    w_h2h_t = params["W_h2h"].astype(f32).T                            # (H, H)
    w_score = params["W_score"].astype(f32)                            # (1, H)
    w_fused = jnp.concatenate(
        [w_ih[:, :D].T, params["W_hh"].astype(f32).T], axis=0)         # (D+H, 4H)
    w_gen_t = jnp.zeros((H, Cp), f32).at[:, :C].set(params["W_gen"].astype(f32).T)
    b_gen = jnp.zeros((1, Cp), f32).at[:, :C].set(params["b_gen"].astype(f32)[None, :])

    const = lambda shape: pl.BlockSpec(shape, lambda b, s: (0, 0))

    out = pl.pallas_call(
        _attn_decoder_kernel,
        out_shape=jax.ShapeDtypeStruct((S_pad, B, Cp), f32),
        grid=(B // bt, n_sc),
        in_specs=[
            pl.BlockSpec((bt, T, H), lambda b, s: (b, 0, 0)),   # hproj (revisited)
            pl.BlockSpec((bt, T, D), lambda b, s: (b, 0, 0)),   # batch_H (revisited)
            pl.BlockSpec((sc, bt, G), lambda b, s: (s, b, 0)),  # ohg
            const((H, H)),       # w_h2h_t
            const((1, H)),       # w_score
            const((D + H, G)),   # w_fused
            const((H, Cp)),      # w_gen_t
            const((1, Cp)),      # b_gen
        ],
        out_specs=pl.BlockSpec((sc, bt, Cp), lambda b, s: (s, b, 0)),
        scratch_shapes=[pltpu.VMEM((bt, H), f32),                # h carry
                        pltpu.VMEM((bt, H), f32)],               # c carry
        compiler_params=pltpu.CompilerParams(
            dimension_semantics=("parallel", "arbitrary"),
            vmem_limit_bytes=_vmem_limit_bytes(
                bt, T, D, H, sc, Cp,
                jnp.dtype(cd).itemsize, jnp.dtype(cd).itemsize),
        ),
    )(hproj.astype(cd), bH.astype(cd), ohg.astype(cd),
      w_h2h_t.astype(cd), w_score, w_fused.astype(cd), w_gen_t.astype(cd), b_gen)

    # Slice padded class/step dims BEFORE transposing -> only (B,S,C) bytes move.
    return jnp.transpose(out[:S, :, :C], (1, 0, 2))                    # (B,S,C)


# ----------------------------------------------------------------------------
# Pure-JAX reference (mirrors the PyTorch AttentionCell loop + generator).
# ----------------------------------------------------------------------------
def attention_reference(batch_H, text, p, *, num_classes, batch_max_length):
    B, T, D = batch_H.shape
    H = p["W_h2h"].shape[0]
    S = batch_max_length + 1
    h = jnp.zeros((B, H), jnp.float32)
    c = jnp.zeros((B, H), jnp.float32)
    hproj = batch_H @ p["W_i2h"].T                                     # (B, T, H)
    out = []
    for i in range(S):
        onehot = jax.nn.one_hot(text[:, i], num_classes, dtype=jnp.float32)
        prev_proj = h @ p["W_h2h"].T + p["b_h2h"]
        s = jnp.tanh(hproj + prev_proj[:, None, :])
        e = s @ p["W_score"].T                                         # (B, T, 1)
        alpha = jax.nn.softmax(e, axis=1)
        context = jnp.sum(alpha * batch_H, axis=1)                     # (B, D)
        x = jnp.concatenate([context, onehot], axis=1)
        gates = x @ p["W_ih"].T + p["b_ih"] + h @ p["W_hh"].T + p["b_hh"]
        i_g, f_g, g_g, o_g = jnp.split(gates, 4, axis=1)
        c = jax.nn.sigmoid(f_g) * c + jax.nn.sigmoid(i_g) * jnp.tanh(g_g)
        h = jax.nn.sigmoid(o_g) * jnp.tanh(c)
        out.append(h @ p["W_gen"].T + p["b_gen"])
    return jnp.stack(out, axis=1)                                      # (B, S, C)


# ----------------------------------------------------------------------------
# Deterministic parameter init + demo.
# ----------------------------------------------------------------------------
def init_params(key, input_size, hidden_size, num_classes):
    D, H, C = input_size, hidden_size, num_classes
    ks = jax.random.split(key, 10)
    u = lambda k, shape: jax.random.uniform(k, shape, jnp.float32, -0.1, 0.1)
    return {
        "W_i2h": u(ks[0], (H, D)),
        "W_h2h": u(ks[1], (H, H)),
        "b_h2h": u(ks[2], (H,)),
        "W_score": u(ks[3], (1, H)),
        "W_ih": u(ks[4], (4 * H, D + C)),   # LSTM gate order: i, f, g, o
        "W_hh": u(ks[5], (4 * H, H)),
        "b_ih": u(ks[6], (4 * H,)),
        "b_hh": u(ks[7], (4 * H,)),
        "W_gen": u(ks[8], (C, H)),
        "b_gen": u(ks[9], (C,)),
    }


if __name__ == "__main__":
    B, T, D, H, C = 2, 8, 16, 32, 10
    batch_max_length = 7                      # -> num_steps S = 8

    key = jax.random.PRNGKey(0)
    k_par, k_feat, k_txt = jax.random.split(key, 3)

    params = init_params(k_par, D, H, C)
    batch_H = jax.random.normal(k_feat, (B, T, D), jnp.float32)
    text = jax.random.randint(k_txt, (B, batch_max_length + 1), 0, C, jnp.int32)
    text = text.at[:, 0].set(0)               # [GO] token

    probs = attention_forward(
        batch_H, text, params,
        num_classes=C, batch_max_length=batch_max_length,
        s_chunk=4,                            # exercise the chunked S axis
    )
    probs = jax.block_until_ready(probs)

    ref = attention_reference(
        batch_H, text, params,
        num_classes=C, batch_max_length=batch_max_length,
    )
    np.testing.assert_allclose(np.asarray(probs), np.asarray(ref),
                               rtol=2e-2, atol=2e-2)
    assert probs.shape == (B, batch_max_length + 1, C)
    print("KERNEL_OK")
</pallas_src>

<mosaic_0001>
module attributes {stable_mosaic.version = 11 : i64} {
  func.func @_attn_decoder_kernel(%arg0: i32, %arg1: i32, %arg2: memref<2x8x32xbf16, #tpu.memory_space<vmem>>, %arg3: memref<2x8x16xbf16, #tpu.memory_space<vmem>>, %arg4: memref<4x2x128xbf16, #tpu.memory_space<vmem>>, %arg5: memref<32x32xbf16, #tpu.memory_space<vmem>>, %arg6: memref<1x32xf32, #tpu.memory_space<vmem>>, %arg7: memref<48x128xbf16, #tpu.memory_space<vmem>>, %arg8: memref<32x128xbf16, #tpu.memory_space<vmem>>, %arg9: memref<1x128xf32, #tpu.memory_space<vmem>>, %arg10: memref<4x2x128xf32, #tpu.memory_space<vmem>>, %arg11: memref<2x32xf32, #tpu.memory_space<vmem>>, %arg12: memref<2x32xf32, #tpu.memory_space<vmem>>) attributes {dimension_semantics = [#tpu.dimension_semantics<parallel>, #tpu.dimension_semantics<arbitrary>], iteration_bounds = array<i64: 1, 2>, scalar_prefetch = 0 : i64, scratch_operands = 2 : i64, tpu.core_type = #tpu.core_type<tc>, window_params = [{transform_indices = @transform_0, window_bounds = array<i64: 2, 8, 32>}, {transform_indices = @transform_1, window_bounds = array<i64: 2, 8, 16>}, {transform_indices = @transform_2, window_bounds = array<i64: 4, 2, 128>}, {pipeline_mode = #tpu.pipeline_mode<synchronous>, transform_indices = @transform_3, window_bounds = array<i64: 32, 32>}, {pipeline_mode = #tpu.pipeline_mode<synchronous>, transform_indices = @transform_4, window_bounds = array<i64: 1, 32>}, {pipeline_mode = #tpu.pipeline_mode<synchronous>, transform_indices = @transform_5, window_bounds = array<i64: 48, 128>}, {pipeline_mode = #tpu.pipeline_mode<synchronous>, transform_indices = @transform_6, window_bounds = array<i64: 32, 128>}, {pipeline_mode = #tpu.pipeline_mode<synchronous>, transform_indices = @transform_7, window_bounds = array<i64: 1, 128>}, {transform_indices = @transform_8, window_bounds = array<i64: 4, 2, 128>}]} {
    %c0_i32 = arith.constant 0 : i32
    %0 = arith.cmpi eq, %arg1, %c0_i32 : i32
    %1 = arith.extui %0 : i1 to i32
    %c0_i32_0 = arith.constant 0 : i32
    %2 = arith.cmpi ne, %1, %c0_i32_0 : i32
    scf.if %2 {
      %cst_80 = arith.constant 0.000000e+00 : f32
      %273 = vector.broadcast %cst_80 : f32 to vector<2x32xf32>
      %c0_81 = arith.constant 0 : index
      %c0_82 = arith.constant 0 : index
      %274 = vector.load %arg11[%c0_81, %c0_82] : memref<2x32xf32, #tpu.memory_space<vmem>>, vector<2x32xf32>
      tpu.vector_store %arg11[%c0_81, %c0_82], %273 {strides = array<i32>} : memref<2x32xf32, #tpu.memory_space<vmem>>, vector<2x32xf32>,
      %cst_83 = arith.constant 0.000000e+00 : f32
      %275 = vector.broadcast %cst_83 : f32 to vector<2x32xf32>
      %c0_84 = arith.constant 0 : index
      %c0_85 = arith.constant 0 : index
      %276 = vector.load %arg12[%c0_84, %c0_85] : memref<2x32xf32, #tpu.memory_space<vmem>>, vector<2x32xf32>
      tpu.vector_store %arg12[%c0_84, %c0_85], %275 {strides = array<i32>} : memref<2x32xf32, #tpu.memory_space<vmem>>, vector<2x32xf32>,
    } else {
    }
    %c0 = arith.constant 0 : index
    %c0_1 = arith.constant 0 : index
    %c0_2 = arith.constant 0 : index
    %3 = vector.load %arg2[%c0, %c0_1, %c0_2] : memref<2x8x32xbf16, #tpu.memory_space<vmem>>, vector<2x8x32xbf16>
    %4 = arith.extf %3 : vector<2x8x32xbf16> to vector<2x8x32xf32>
    %c0_3 = arith.constant 0 : index
    %c0_4 = arith.constant 0 : index
    %c0_5 = arith.constant 0 : index
    %5 = vector.load %arg3[%c0_3, %c0_4, %c0_5] : memref<2x8x16xbf16, #tpu.memory_space<vmem>>, vector<2x8x16xbf16>
    %6 = arith.extf %5 : vector<2x8x16xbf16> to vector<2x8x16xf32>
    %c0_6 = arith.constant 0 : index
    %c0_7 = arith.constant 0 : index
    %7 = vector.load %arg5[%c0_6, %c0_7] : memref<32x32xbf16, #tpu.memory_space<vmem>>, vector<32x32xbf16>
    %c0_8 = arith.constant 0 : index
    %c0_9 = arith.constant 0 : index
    %8 = vector.load %arg6[%c0_8, %c0_9] : memref<1x32xf32, #tpu.memory_space<vmem>>, vector<1x32xf32>
    %9 = vector.shape_cast %8 : vector<1x32xf32> to vector<1x1x32xf32>
    %c0_10 = arith.constant 0 : index
    %c0_11 = arith.constant 0 : index
    %10 = vector.load %arg7[%c0_10, %c0_11] : memref<48x128xbf16, #tpu.memory_space<vmem>>, vector<48x128xbf16>
    %c0_12 = arith.constant 0 : index
    %c0_13 = arith.constant 0 : index
    %11 = vector.load %arg8[%c0_12, %c0_13] : memref<32x128xbf16, #tpu.memory_space<vmem>>, vector<32x128xbf16>
    %c0_14 = arith.constant 0 : index
    %c0_15 = arith.constant 0 : index
    %12 = vector.load %arg9[%c0_14, %c0_15] : memref<1x128xf32, #tpu.memory_space<vmem>>, vector<1x128xf32>
    %c0_16 = arith.constant 0 : index
    %c0_17 = arith.constant 0 : index
    %13 = vector.load %arg11[%c0_16, %c0_17] : memref<2x32xf32, #tpu.memory_space<vmem>>, vector<2x32xf32>
    %c0_18 = arith.constant 0 : index
    %c0_19 = arith.constant 0 : index
    %14 = vector.load %arg12[%c0_18, %c0_19] : memref<2x32xf32, #tpu.memory_space<vmem>>, vector<2x32xf32>
    %c0_i32_20 = arith.constant 0 : i32
    %15 = arith.truncf %13 : vector<2x32xf32> to vector<2x32xbf16>
    %cst = arith.constant dense<0.000000e+00> : vector<2x32xf32>
    %16 = tpu.matmul %15, %7, %cst {dimension_numbers = #tpu.dot_dimension_numbers<[1], [0], [0], [1], [0, 0, 1, 1], [], []>} : vector<2x32xbf16>, vector<32x32xbf16>, vector<2x32xf32> -> vector<2x32xf32>
    %17 = vector.shape_cast %16 : vector<2x32xf32> to vector<2x1x32xf32>
    %18 = vector.broadcast %17 : vector<2x1x32xf32> to vector<2x8x32xf32>
    %19 = arith.addf %4, %18 : vector<2x8x32xf32>
    %20 = math.tanh %19 : vector<2x8x32xf32>
    %21 = vector.broadcast %9 : vector<1x1x32xf32> to vector<2x8x32xf32>
    %22 = arith.mulf %20, %21 : vector<2x8x32xf32>
    %cst_21 = arith.constant dense<0.000000e+00> : vector<2x8xf32>
    %23 = vector.multi_reduction <add>, %22, %cst_21 [2] : vector<2x8x32xf32> to vector<2x8xf32>
    %cst_22 = arith.constant dense<0xFF800000> : vector<2xf32>
    %24 = vector.multi_reduction <maximumf>, %23, %cst_22 [1] : vector<2x8xf32> to vector<2xf32>
    %25 = vector.shape_cast %24 : vector<2xf32> to vector<2x1xf32>
    %26 = vector.broadcast %25 : vector<2x1xf32> to vector<2x8xf32>
    %27 = arith.subf %23, %26 : vector<2x8xf32>
    %28 = math.exp %27 : vector<2x8xf32>
    %cst_23 = arith.constant dense<0.000000e+00> : vector<2xf32>
    %29 = vector.multi_reduction <add>, %28, %cst_23 [1] : vector<2x8xf32> to vector<2xf32>
    %30 = vector.shape_cast %29 : vector<2xf32> to vector<2x1xf32>
    %31 = tpu.reciprocal %30 {approx = true} : vector<2x1xf32> -> vector<2x1xf32>
    %32 = vector.broadcast %31 : vector<2x1xf32> to vector<2x8xf32>
    %33 = arith.mulf %28, %32 : vector<2x8xf32>
    %34 = vector.shape_cast %33 : vector<2x8xf32> to vector<2x8x1xf32>
    %35 = vector.broadcast %34 : vector<2x8x1xf32> to vector<2x8x16xf32>
    %36 = arith.mulf %35, %6 : vector<2x8x16xf32>
    %cst_24 = arith.constant dense<0.000000e+00> : vector<2x16xf32>
    %37 = vector.multi_reduction <add>, %36, %cst_24 [1] : vector<2x8x16xf32> to vector<2x16xf32>
    %38 = tpu.concatenate %37, %13 in 1 : vector<2x16xf32>, vector<2x32xf32> -> vector<2x48xf32>
    %39 = arith.truncf %38 : vector<2x48xf32> to vector<2x48xbf16>
    %cst_25 = arith.constant dense<0.000000e+00> : vector<2x128xf32>
    %40 = tpu.matmul %39, %10, %cst_25 {dimension_numbers = #tpu.dot_dimension_numbers<[1], [0], [0], [1], [0, 0, 1, 1], [], []>} : vector<2x48xbf16>, vector<48x128xbf16>, vector<2x128xf32> -> vector<2x128xf32>
    %41 = arith.index_cast %c0_i32_20 : i32 to index
    %c0_26 = arith.constant 0 : index
    %c0_27 = arith.constant 0 : index
    %42 = vector.load %arg4[%41, %c0_26, %c0_27] : memref<4x2x128xbf16, #tpu.memory_space<vmem>>, vector<1x2x128xbf16>
    %43 = vector.shape_cast %42 : vector<1x2x128xbf16> to vector<2x128xbf16>
    %44 = arith.extf %43 : vector<2x128xbf16> to vector<2x128xf32>
    %45 = arith.addf %40, %44 : vector<2x128xf32>
    %46 = vector.extract_strided_slice %45 {offsets = [0, 0], sizes = [2, 32], strides = [1, 1]} : vector<2x128xf32> to vector<2x32xf32>
    %47 = arith.negf %46 : vector<2x32xf32>
    %48 = math.exp %47 : vector<2x32xf32>
    %cst_28 = arith.constant 1.000000e+00 : f32
    %49 = vector.broadcast %cst_28 : f32 to vector<2x32xf32>
    %50 = arith.addf %49, %48 : vector<2x32xf32>
    %51 = arith.divf %49, %50 : vector<2x32xf32>
    %52 = vector.extract_strided_slice %45 {offsets = [0, 32], sizes = [2, 32], strides = [1, 1]} : vector<2x128xf32> to vector<2x32xf32>
    %53 = arith.negf %52 : vector<2x32xf32>
    %54 = math.exp %53 : vector<2x32xf32>
    %cst_29 = arith.constant 1.000000e+00 : f32
    %55 = vector.broadcast %cst_29 : f32 to vector<2x32xf32>
    %56 = arith.addf %55, %54 : vector<2x32xf32>
    %57 = arith.divf %55, %56 : vector<2x32xf32>
    %58 = vector.extract_strided_slice %45 {offsets = [0, 64], sizes = [2, 32], strides = [1, 1]} : vector<2x128xf32> to vector<2x32xf32>
    %59 = math.tanh %58 : vector<2x32xf32>
    %60 = vector.extract_strided_slice %45 {offsets = [0, 96], sizes = [2, 32], strides = [1, 1]} : vector<2x128xf32> to vector<2x32xf32>
    %61 = arith.negf %60 : vector<2x32xf32>
    %62 = math.exp %61 : vector<2x32xf32>
    %cst_30 = arith.constant 1.000000e+00 : f32
    %63 = vector.broadcast %cst_30 : f32 to vector<2x32xf32>
    %64 = arith.addf %63, %62 : vector<2x32xf32>
    %65 = arith.divf %63, %64 : vector<2x32xf32>
    %66 = arith.mulf %57, %14 : vector<2x32xf32>
    %67 = arith.mulf %51, %59 : vector<2x32xf32>
    %68 = arith.addf %66, %67 : vector<2x32xf32>
    %69 = math.tanh %68 : vector<2x32xf32>
    %70 = arith.mulf %65, %69 : vector<2x32xf32>
    %71 = arith.truncf %70 : vector<2x32xf32> to vector<2x32xbf16>
    %cst_31 = arith.constant dense<0.000000e+00> : vector<2x128xf32>
    %72 = tpu.matmul %71, %11, %cst_31 {dimension_numbers = #tpu.dot_dimension_numbers<[1], [0], [0], [1], [0, 0, 1, 1], [], []>} : vector<2x32xbf16>, vector<32x128xbf16>, vector<2x128xf32> -> vector<2x128xf32>
    %73 = vector.broadcast %12 : vector<1x128xf32> to vector<2x128xf32>
    %74 = arith.addf %72, %73 : vector<2x128xf32>
    %75 = arith.index_cast %c0_i32_20 : i32 to index
    %c0_32 = arith.constant 0 : index
    %c0_33 = arith.constant 0 : index
    %76 = vector.load %arg10[%75, %c0_32, %c0_33] : memref<4x2x128xf32, #tpu.memory_space<vmem>>, vector<1x2x128xf32>
    %77 = vector.shape_cast %76 : vector<1x2x128xf32> to vector<2x128xf32>
    %78 = vector.shape_cast %74 : vector<2x128xf32> to vector<1x2x128xf32>
    tpu.vector_store %arg10[%75, %c0_32, %c0_33], %78 {strides = array<i32>} : memref<4x2x128xf32, #tpu.memory_space<vmem>>, vector<1x2x128xf32>,
    %c1_i32 = arith.constant 1 : i32
    %79 = arith.truncf %70 : vector<2x32xf32> to vector<2x32xbf16>
    %cst_34 = arith.constant dense<0.000000e+00> : vector<2x32xf32>
    %80 = tpu.matmul %79, %7, %cst_34 {dimension_numbers = #tpu.dot_dimension_numbers<[1], [0], [0], [1], [0, 0, 1, 1], [], []>} : vector<2x32xbf16>, vector<32x32xbf16>, vector<2x32xf32> -> vector<2x32xf32>
    %81 = vector.shape_cast %80 : vector<2x32xf32> to vector<2x1x32xf32>
    %82 = vector.broadcast %81 : vector<2x1x32xf32> to vector<2x8x32xf32>
    %83 = arith.addf %4, %82 : vector<2x8x32xf32>
    %84 = math.tanh %83 : vector<2x8x32xf32>
    %85 = vector.broadcast %9 : vector<1x1x32xf32> to vector<2x8x32xf32>
    %86 = arith.mulf %84, %85 : vector<2x8x32xf32>
    %cst_35 = arith.constant dense<0.000000e+00> : vector<2x8xf32>
    %87 = vector.multi_reduction <add>, %86, %cst_35 [2] : vector<2x8x32xf32> to vector<2x8xf32>
    %cst_36 = arith.constant dense<0xFF800000> : vector<2xf32>
    %88 = vector.multi_reduction <maximumf>, %87, %cst_36 [1] : vector<2x8xf32> to vector<2xf32>
    %89 = vector.shape_cast %88 : vector<2xf32> to vector<2x1xf32>
    %90 = vector.broadcast %89 : vector<2x1xf32> to vector<2x8xf32>
    %91 = arith.subf %87, %90 : vector<2x8xf32>
    %92 = math.exp %91 : vector<2x8xf32>
    %cst_37 = arith.constant dense<0.000000e+00> : vector<2xf32>
    %93 = vector.multi_reduction <add>, %92, %cst_37 [1] : vector<2x8xf32> to vector<2xf32>
    %94 = vector.shape_cast %93 : vector<2xf32> to vector<2x1xf32>
    %95 = tpu.reciprocal %94 {approx = true} : vector<2x1xf32> -> vector<2x1xf32>
    %96 = vector.broadcast %95 : vector<2x1xf32> to vector<2x8xf32>
    %97 = arith.mulf %92, %96 : vector<2x8xf32>
    %98 = vector.shape_cast %97 : vector<2x8xf32> to vector<2x8x1xf32>
    %99 = vector.broadcast %98 : vector<2x8x1xf32> to vector<2x8x16xf32>
    %100 = arith.mulf %99, %6 : vector<2x8x16xf32>
    %cst_38 = arith.constant dense<0.000000e+00> : vector<2x16xf32>
    %101 = vector.multi_reduction <add>, %100, %cst_38 [1] : vector<2x8x16xf32> to vector<2x16xf32>
    %102 = tpu.concatenate %101, %70 in 1 : vector<2x16xf32>, vector<2x32xf32> -> vector<2x48xf32>
    %103 = arith.truncf %102 : vector<2x48xf32> to vector<2x48xbf16>
    %cst_39 = arith.constant dense<0.000000e+00> : vector<2x128xf32>
    %104 = tpu.matmul %103, %10, %cst_39 {dimension_numbers = #tpu.dot_dimension_numbers<[1], [0], [0], [1], [0, 0, 1, 1], [], []>} : vector<2x48xbf16>, vector<48x128xbf16>, vector<2x128xf32> -> vector<2x128xf32>
    %105 = arith.index_cast %c1_i32 : i32 to index
    %c0_40 = arith.constant 0 : index
    %c0_41 = arith.constant 0 : index
    %106 = vector.load %arg4[%105, %c0_40, %c0_41] : memref<4x2x128xbf16, #tpu.memory_space<vmem>>, vector<1x2x128xbf16>
    %107 = vector.shape_cast %106 : vector<1x2x128xbf16> to vector<2x128xbf16>
    %108 = arith.extf %107 : vector<2x128xbf16> to vector<2x128xf32>
    %109 = arith.addf %104, %108 : vector<2x128xf32>
    %110 = vector.extract_strided_slice %109 {offsets = [0, 0], sizes = [2, 32], strides = [1, 1]} : vector<2x128xf32> to vector<2x32xf32>
    %111 = arith.negf %110 : vector<2x32xf32>
    %112 = math.exp %111 : vector<2x32xf32>
    %cst_42 = arith.constant 1.000000e+00 : f32
    %113 = vector.broadcast %cst_42 : f32 to vector<2x32xf32>
    %114 = arith.addf %113, %112 : vector<2x32xf32>
    %115 = arith.divf %113, %114 : vector<2x32xf32>
    %116 = vector.extract_strided_slice %109 {offsets = [0, 32], sizes = [2, 32], strides = [1, 1]} : vector<2x128xf32> to vector<2x32xf32>
    %117 = arith.negf %116 : vector<2x32xf32>
    %118 = math.exp %117 : vector<2x32xf32>
    %cst_43 = arith.constant 1.000000e+00 : f32
    %119 = vector.broadcast %cst_43 : f32 to vector<2x32xf32>
    %120 = arith.addf %119, %118 : vector<2x32xf32>
    %121 = arith.divf %119, %120 : vector<2x32xf32>
    %122 = vector.extract_strided_slice %109 {offsets = [0, 64], sizes = [2, 32], strides = [1, 1]} : vector<2x128xf32> to vector<2x32xf32>
    %123 = math.tanh %122 : vector<2x32xf32>
    %124 = vector.extract_strided_slice %109 {offsets = [0, 96], sizes = [2, 32], strides = [1, 1]} : vector<2x128xf32> to vector<2x32xf32>
    %125 = arith.negf %124 : vector<2x32xf32>
    %126 = math.exp %125 : vector<2x32xf32>
    %cst_44 = arith.constant 1.000000e+00 : f32
    %127 = vector.broadcast %cst_44 : f32 to vector<2x32xf32>
    %128 = arith.addf %127, %126 : vector<2x32xf32>
    %129 = arith.divf %127, %128 : vector<2x32xf32>
    %130 = arith.mulf %121, %68 : vector<2x32xf32>
    %131 = arith.mulf %115, %123 : vector<2x32xf32>
    %132 = arith.addf %130, %131 : vector<2x32xf32>
    %133 = math.tanh %132 : vector<2x32xf32>
    %134 = arith.mulf %129, %133 : vector<2x32xf32>
    %135 = arith.truncf %134 : vector<2x32xf32> to vector<2x32xbf16>
    %cst_45 = arith.constant dense<0.000000e+00> : vector<2x128xf32>
    %136 = tpu.matmul %135, %11, %cst_45 {dimension_numbers = #tpu.dot_dimension_numbers<[1], [0], [0], [1], [0, 0, 1, 1], [], []>} : vector<2x32xbf16>, vector<32x128xbf16>, vector<2x128xf32> -> vector<2x128xf32>
    %137 = vector.broadcast %12 : vector<1x128xf32> to vector<2x128xf32>
    %138 = arith.addf %136, %137 : vector<2x128xf32>
    %139 = arith.index_cast %c1_i32 : i32 to index
    %c0_46 = arith.constant 0 : index
    %c0_47 = arith.constant 0 : index
    %140 = vector.load %arg10[%139, %c0_46, %c0_47] : memref<4x2x128xf32, #tpu.memory_space<vmem>>, vector<1x2x128xf32>
    %141 = vector.shape_cast %140 : vector<1x2x128xf32> to vector<2x128xf32>
    %142 = vector.shape_cast %138 : vector<2x128xf32> to vector<1x2x128xf32>
    tpu.vector_store %arg10[%139, %c0_46, %c0_47], %142 {strides = array<i32>} : memref<4x2x128xf32, #tpu.memory_space<vmem>>, vector<1x2x128xf32>,
    %c2_i32 = arith.constant 2 : i32
    %143 = arith.truncf %134 : vector<2x32xf32> to vector<2x32xbf16>
    %cst_48 = arith.constant dense<0.000000e+00> : vector<2x32xf32>
    %144 = tpu.matmul %143, %7, %cst_48 {dimension_numbers = #tpu.dot_dimension_numbers<[1], [0], [0], [1], [0, 0, 1, 1], [], []>} : vector<2x32xbf16>, vector<32x32xbf16>, vector<2x32xf32> -> vector<2x32xf32>
    %145 = vector.shape_cast %144 : vector<2x32xf32> to vector<2x1x32xf32>
    %146 = vector.broadcast %145 : vector<2x1x32xf32> to vector<2x8x32xf32>
    %147 = arith.addf %4, %146 : vector<2x8x32xf32>
    %148 = math.tanh %147 : vector<2x8x32xf32>
    %149 = vector.broadcast %9 : vector<1x1x32xf32> to vector<2x8x32xf32>
    %150 = arith.mulf %148, %149 : vector<2x8x32xf32>
    %cst_49 = arith.constant dense<0.000000e+00> : vector<2x8xf32>
    %151 = vector.multi_reduction <add>, %150, %cst_49 [2] : vector<2x8x32xf32> to vector<2x8xf32>
    %cst_50 = arith.constant dense<0xFF800000> : vector<2xf32>
    %152 = vector.multi_reduction <maximumf>, %151, %cst_50 [1] : vector<2x8xf32> to vector<2xf32>
    %153 = vector.shape_cast %152 : vector<2xf32> to vector<2x1xf32>
    %154 = vector.broadcast %153 : vector<2x1xf32> to vector<2x8xf32>
    %155 = arith.subf %151, %154 : vector<2x8xf32>
    %156 = math.exp %155 : vector<2x8xf32>
    %cst_51 = arith.constant dense<0.000000e+00> : vector<2xf32>
    %157 = vector.multi_reduction <add>, %156, %cst_51 [1] : vector<2x8xf32> to vector<2xf32>
    %158 = vector.shape_cast %157 : vector<2xf32> to vector<2x1xf32>
    %159 = tpu.reciprocal %158 {approx = true} : vector<2x1xf32> -> vector<2x1xf32>
    %160 = vector.broadcast %159 : vector<2x1xf32> to vector<2x8xf32>
    %161 = arith.mulf %156, %160 : vector<2x8xf32>
    %162 = vector.shape_cast %161 : vector<2x8xf32> to vector<2x8x1xf32>
    %163 = vector.broadcast %162 : vector<2x8x1xf32> to vector<2x8x16xf32>
    %164 = arith.mulf %163, %6 : vector<2x8x16xf32>
    %cst_52 = arith.constant dense<0.000000e+00> : vector<2x16xf32>
    %165 = vector.multi_reduction <add>, %164, %cst_52 [1] : vector<2x8x16xf32> to vector<2x16xf32>
    %166 = tpu.concatenate %165, %134 in 1 : vector<2x16xf32>, vector<2x32xf32> -> vector<2x48xf32>
    %167 = arith.truncf %166 : vector<2x48xf32> to vector<2x48xbf16>
    %cst_53 = arith.constant dense<0.000000e+00> : vector<2x128xf32>
    %168 = tpu.matmul %167, %10, %cst_53 {dimension_numbers = #tpu.dot_dimension_numbers<[1], [0], [0], [1], [0, 0, 1, 1], [], []>} : vector<2x48xbf16>, vector<48x128xbf16>, vector<2x128xf32> -> vector<2x128xf32>
    %169 = arith.index_cast %c2_i32 : i32 to index
    %c0_54 = arith.constant 0 : index
    %c0_55 = arith.constant 0 : index
    %170 = vector.load %arg4[%169, %c0_54, %c0_55] : memref<4x2x128xbf16, #tpu.memory_space<vmem>>, vector<1x2x128xbf16>
    %171 = vector.shape_cast %170 : vector<1x2x128xbf16> to vector<2x128xbf16>
    %172 = arith.extf %171 : vector<2x128xbf16> to vector<2x128xf32>
    %173 = arith.addf %168, %172 : vector<2x128xf32>
    %174 = vector.extract_strided_slice %173 {offsets = [0, 0], sizes = [2, 32], strides = [1, 1]} : vector<2x128xf32> to vector<2x32xf32>
    %175 = arith.negf %174 : vector<2x32xf32>
    %176 = math.exp %175 : vector<2x32xf32>
    %cst_56 = arith.constant 1.000000e+00 : f32
    %177 = vector.broadcast %cst_56 : f32 to vector<2x32xf32>
    %178 = arith.addf %177, %176 : vector<2x32xf32>
    %179 = arith.divf %177, %178 : vector<2x32xf32>
    %180 = vector.extract_strided_slice %173 {offsets = [0, 32], sizes = [2, 32], strides = [1, 1]} : vector<2x128xf32> to vector<2x32xf32>
    %181 = arith.negf %180 : vector<2x32xf32>
    %182 = math.exp %181 : vector<2x32xf32>
    %cst_57 = arith.constant 1.000000e+00 : f32
    %183 = vector.broadcast %cst_57 : f32 to vector<2x32xf32>
    %184 = arith.addf %183, %182 : vector<2x32xf32>
    %185 = arith.divf %183, %184 : vector<2x32xf32>
    %186 = vector.extract_strided_slice %173 {offsets = [0, 64], sizes = [2, 32], strides = [1, 1]} : vector<2x128xf32> to vector<2x32xf32>
    %187 = math.tanh %186 : vector<2x32xf32>
    %188 = vector.extract_strided_slice %173 {offsets = [0, 96], sizes = [2, 32], strides = [1, 1]} : vector<2x128xf32> to vector<2x32xf32>
    %189 = arith.negf %188 : vector<2x32xf32>
    %190 = math.exp %189 : vector<2x32xf32>
    %cst_58 = arith.constant 1.000000e+00 : f32
    %191 = vector.broadcast %cst_58 : f32 to vector<2x32xf32>
    %192 = arith.addf %191, %190 : vector<2x32xf32>
    %193 = arith.divf %191, %192 : vector<2x32xf32>
    %194 = arith.mulf %185, %132 : vector<2x32xf32>
    %195 = arith.mulf %179, %187 : vector<2x32xf32>
    %196 = arith.addf %194, %195 : vector<2x32xf32>
    %197 = math.tanh %196 : vector<2x32xf32>
    %198 = arith.mulf %193, %197 : vector<2x32xf32>
    %199 = arith.truncf %198 : vector<2x32xf32> to vector<2x32xbf16>
    %cst_59 = arith.constant dense<0.000000e+00> : vector<2x128xf32>
    %200 = tpu.matmul %199, %11, %cst_59 {dimension_numbers = #tpu.dot_dimension_numbers<[1], [0], [0], [1], [0, 0, 1, 1], [], []>} : vector<2x32xbf16>, vector<32x128xbf16>, vector<2x128xf32> -> vector<2x128xf32>
    %201 = vector.broadcast %12 : vector<1x128xf32> to vector<2x128xf32>
    %202 = arith.addf %200, %201 : vector<2x128xf32>
    %203 = arith.index_cast %c2_i32 : i32 to index
    %c0_60 = arith.constant 0 : index
    %c0_61 = arith.constant 0 : index
    %204 = vector.load %arg10[%203, %c0_60, %c0_61] : memref<4x2x128xf32, #tpu.memory_space<vmem>>, vector<1x2x128xf32>
    %205 = vector.shape_cast %204 : vector<1x2x128xf32> to vector<2x128xf32>
    %206 = vector.shape_cast %202 : vector<2x128xf32> to vector<1x2x128xf32>
    tpu.vector_store %arg10[%203, %c0_60, %c0_61], %206 {strides = array<i32>} : memref<4x2x128xf32, #tpu.memory_space<vmem>>, vector<1x2x128xf32>,
    %c3_i32 = arith.constant 3 : i32
    %207 = arith.truncf %198 : vector<2x32xf32> to vector<2x32xbf16>
    %cst_62 = arith.constant dense<0.000000e+00> : vector<2x32xf32>
    %208 = tpu.matmul %207, %7, %cst_62 {dimension_numbers = #tpu.dot_dimension_numbers<[1], [0], [0], [1], [0, 0, 1, 1], [], []>} : vector<2x32xbf16>, vector<32x32xbf16>, vector<2x32xf32> -> vector<2x32xf32>
    %209 = vector.shape_cast %208 : vector<2x32xf32> to vector<2x1x32xf32>
    %210 = vector.broadcast %209 : vector<2x1x32xf32> to vector<2x8x32xf32>
    %211 = arith.addf %4, %210 : vector<2x8x32xf32>
    %212 = math.tanh %211 : vector<2x8x32xf32>
    %213 = vector.broadcast %9 : vector<1x1x32xf32> to vector<2x8x32xf32>
    %214 = arith.mulf %212, %213 : vector<2x8x32xf32>
    %cst_63 = arith.constant dense<0.000000e+00> : vector<2x8xf32>
    %215 = vector.multi_reduction <add>, %214, %cst_63 [2] : vector<2x8x32xf32> to vector<2x8xf32>
    %cst_64 = arith.constant dense<0xFF800000> : vector<2xf32>
    %216 = vector.multi_reduction <maximumf>, %215, %cst_64 [1] : vector<2x8xf32> to vector<2xf32>
    %217 = vector.shape_cast %216 : vector<2xf32> to vector<2x1xf32>
    %218 = vector.broadcast %217 : vector<2x1xf32> to vector<2x8xf32>
    %219 = arith.subf %215, %218 : vector<2x8xf32>
    %220 = math.exp %219 : vector<2x8xf32>
    %cst_65 = arith.constant dense<0.000000e+00> : vector<2xf32>
    %221 = vector.multi_reduction <add>, %220, %cst_65 [1] : vector<2x8xf32> to vector<2xf32>
    %222 = vector.shape_cast %221 : vector<2xf32> to vector<2x1xf32>
    %223 = tpu.reciprocal %222 {approx = true} : vector<2x1xf32> -> vector<2x1xf32>
    %224 = vector.broadcast %223 : vector<2x1xf32> to vector<2x8xf32>
    %225 = arith.mulf %220, %224 : vector<2x8xf32>
    %226 = vector.shape_cast %225 : vector<2x8xf32> to vector<2x8x1xf32>
    %227 = vector.broadcast %226 : vector<2x8x1xf32> to vector<2x8x16xf32>
    %228 = arith.mulf %227, %6 : vector<2x8x16xf32>
    %cst_66 = arith.constant dense<0.000000e+00> : vector<2x16xf32>
    %229 = vector.multi_reduction <add>, %228, %cst_66 [1] : vector<2x8x16xf32> to vector<2x16xf32>
    %230 = tpu.concatenate %229, %198 in 1 : vector<2x16xf32>, vector<2x32xf32> -> vector<2x48xf32>
    %231 = arith.truncf %230 : vector<2x48xf32> to vector<2x48xbf16>
    %cst_67 = arith.constant dense<0.000000e+00> : vector<2x128xf32>
    %232 = tpu.matmul %231, %10, %cst_67 {dimension_numbers = #tpu.dot_dimension_numbers<[1], [0], [0], [1], [0, 0, 1, 1], [], []>} : vector<2x48xbf16>, vector<48x128xbf16>, vector<2x128xf32> -> vector<2x128xf32>
    %233 = arith.index_cast %c3_i32 : i32 to index
    %c0_68 = arith.constant 0 : index
    %c0_69 = arith.constant 0 : index
    %234 = vector.load %arg4[%233, %c0_68, %c0_69] : memref<4x2x128xbf16, #tpu.memory_space<vmem>>, vector<1x2x128xbf16>
    %235 = vector.shape_cast %234 : vector<1x2x128xbf16> to vector<2x128xbf16>
    %236 = arith.extf %235 : vector<2x128xbf16> to vector<2x128xf32>
    %237 = arith.addf %232, %236 : vector<2x128xf32>
    %238 = vector.extract_strided_slice %237 {offsets = [0, 0], sizes = [2, 32], strides = [1, 1]} : vector<2x128xf32> to vector<2x32xf32>
    %239 = arith.negf %238 : vector<2x32xf32>
    %240 = math.exp %239 : vector<2x32xf32>
    %cst_70 = arith.constant 1.000000e+00 : f32
    %241 = vector.broadcast %cst_70 : f32 to vector<2x32xf32>
    %242 = arith.addf %241, %240 : vector<2x32xf32>
    %243 = arith.divf %241, %242 : vector<2x32xf32>
    %244 = vector.extract_strided_slice %237 {offsets = [0, 32], sizes = [2, 32], strides = [1, 1]} : vector<2x128xf32> to vector<2x32xf32>
    %245 = arith.negf %244 : vector<2x32xf32>
    %246 = math.exp %245 : vector<2x32xf32>
    %cst_71 = arith.constant 1.000000e+00 : f32
    %247 = vector.broadcast %cst_71 : f32 to vector<2x32xf32>
    %248 = arith.addf %247, %246 : vector<2x32xf32>
    %249 = arith.divf %247, %248 : vector<2x32xf32>
    %250 = vector.extract_strided_slice %237 {offsets = [0, 64], sizes = [2, 32], strides = [1, 1]} : vector<2x128xf32> to vector<2x32xf32>
    %251 = math.tanh %250 : vector<2x32xf32>
    %252 = vector.extract_strided_slice %237 {offsets = [0, 96], sizes = [2, 32], strides = [1, 1]} : vector<2x128xf32> to vector<2x32xf32>
    %253 = arith.negf %252 : vector<2x32xf32>
    %254 = math.exp %253 : vector<2x32xf32>
    %cst_72 = arith.constant 1.000000e+00 : f32
    %255 = vector.broadcast %cst_72 : f32 to vector<2x32xf32>
    %256 = arith.addf %255, %254 : vector<2x32xf32>
    %257 = arith.divf %255, %256 : vector<2x32xf32>
    %258 = arith.mulf %249, %196 : vector<2x32xf32>
    %259 = arith.mulf %243, %251 : vector<2x32xf32>
    %260 = arith.addf %258, %259 : vector<2x32xf32>
    %261 = math.tanh %260 : vector<2x32xf32>
    %262 = arith.mulf %257, %261 : vector<2x32xf32>
    %263 = arith.truncf %262 : vector<2x32xf32> to vector<2x32xbf16>
    %cst_73 = arith.constant dense<0.000000e+00> : vector<2x128xf32>
    %264 = tpu.matmul %263, %11, %cst_73 {dimension_numbers = #tpu.dot_dimension_numbers<[1], [0], [0], [1], [0, 0, 1, 1], [], []>} : vector<2x32xbf16>, vector<32x128xbf16>, vector<2x128xf32> -> vector<2x128xf32>
    %265 = vector.broadcast %12 : vector<1x128xf32> to vector<2x128xf32>
    %266 = arith.addf %264, %265 : vector<2x128xf32>
    %267 = arith.index_cast %c3_i32 : i32 to index
    %c0_74 = arith.constant 0 : index
    %c0_75 = arith.constant 0 : index
    %268 = vector.load %arg10[%267, %c0_74, %c0_75] : memref<4x2x128xf32, #tpu.memory_space<vmem>>, vector<1x2x128xf32>
    %269 = vector.shape_cast %268 : vector<1x2x128xf32> to vector<2x128xf32>
    %270 = vector.shape_cast %266 : vector<2x128xf32> to vector<1x2x128xf32>
    tpu.vector_store %arg10[%267, %c0_74, %c0_75], %270 {strides = array<i32>} : memref<4x2x128xf32, #tpu.memory_space<vmem>>, vector<1x2x128xf32>,
    %c4_i32 = arith.constant 4 : i32
    %c0_76 = arith.constant 0 : index
    %c0_77 = arith.constant 0 : index
    %271 = vector.load %arg11[%c0_76, %c0_77] : memref<2x32xf32, #tpu.memory_space<vmem>>, vector<2x32xf32>
    tpu.vector_store %arg11[%c0_76, %c0_77], %262 {strides = array<i32>} : memref<2x32xf32, #tpu.memory_space<vmem>>, vector<2x32xf32>,
    %c0_78 = arith.constant 0 : index
    %c0_79 = arith.constant 0 : index
    %272 = vector.load %arg12[%c0_78, %c0_79] : memref<2x32xf32, #tpu.memory_space<vmem>>, vector<2x32xf32>
    tpu.vector_store %arg12[%c0_78, %c0_79], %260 {strides = array<i32>} : memref<2x32xf32, #tpu.memory_space<vmem>>, vector<2x32xf32>,
    return
  }
  func.func @transform_0(%arg0: i32, %arg1: i32) -> (i32, i32, i32) {
    %c0_i32 = arith.constant 0 : i32
    %c0_i32_0 = arith.constant 0 : i32
    %c0_i32_1 = arith.constant 0 : i32
    return %arg0, %c0_i32, %c0_i32_0 : i32, i32, i32
  }
  func.func @transform_1(%arg0: i32, %arg1: i32) -> (i32, i32, i32) {
    %c0_i32 = arith.constant 0 : i32
    %c0_i32_0 = arith.constant 0 : i32
    %c0_i32_1 = arith.constant 0 : i32
    return %arg0, %c0_i32, %c0_i32_0 : i32, i32, i32
  }
  func.func @transform_2(%arg0: i32, %arg1: i32) -> (i32, i32, i32) {
    %c0_i32 = arith.constant 0 : i32
    %c0_i32_0 = arith.constant 0 : i32
    return %arg1, %arg0, %c0_i32 : i32, i32, i32
  }
  func.func @transform_3(%arg0: i32, %arg1: i32) -> (i32, i32) {
    %c0_i32 = arith.constant 0 : i32
    %c0_i32_0 = arith.constant 0 : i32
    %c0_i32_1 = arith.constant 0 : i32
    return %c0_i32, %c0_i32_0 : i32, i32
  }
  func.func @transform_4(%arg0: i32, %arg1: i32) -> (i32, i32) {
    %c0_i32 = arith.constant 0 : i32
    %c0_i32_0 = arith.constant 0 : i32
    %c0_i32_1 = arith.constant 0 : i32
    return %c0_i32, %c0_i32_0 : i32, i32
  }
  func.func @transform_5(%arg0: i32, %arg1: i32) -> (i32, i32) {
    %c0_i32 = arith.constant 0 : i32
    %c0_i32_0 = arith.constant 0 : i32
    %c0_i32_1 = arith.constant 0 : i32
    return %c0_i32, %c0_i32_0 : i32, i32
  }
  func.func @transform_6(%arg0: i32, %arg1: i32) -> (i32, i32) {
    %c0_i32 = arith.constant 0 : i32
    %c0_i32_0 = arith.constant 0 : i32
    %c0_i32_1 = arith.constant 0 : i32
    return %c0_i32, %c0_i32_0 : i32, i32
  }
  func.func @transform_7(%arg0: i32, %arg1: i32) -> (i32, i32) {
    %c0_i32 = arith.constant 0 : i32
    %c0_i32_0 = arith.constant 0 : i32
    %c0_i32_1 = arith.constant 0 : i32
    return %c0_i32, %c0_i32_0 : i32, i32
  }
  func.func @transform_8(%arg0: i32, %arg1: i32) -> (i32, i32, i32) {
    %c0_i32 = arith.constant 0 : i32
    %c0_i32_0 = arith.constant 0 : i32
    return %arg1, %arg0, %c0_i32 : i32, i32, i32
  }
}

</mosaic_0001>

<bundles_post_ra>
// kernel: attention_forward.1
= control target key start
LH: loop header
LB: loop body
LE: loop exit
PB: predicated region body
PF: predicated region fallthrough
CT: control target
= control target key end

     0   :  { %s1606_s27 = smov 0   ;;  %s1608_s28 = smov 0   ;;  %s1862_s0 = inlined_call_operand.vmem [shape: bf16[2,8,32], index: 0, kind: input, shape index: {}]   ;;  %s1863_s1 = inlined_call_operand.vmem [shape: bf16[2,8,16], index: 1, kind: input, shape index: {}]   ;;  %s1864_s2 = inlined_call_operand.vmem [shape: bf16[8,2,128], index: 2, kind: input, shape index: {}]   ;;  %s1865_s3 = inlined_call_operand.vmem [shape: bf16[32,32], index: 3, kind: input, shape index: {}]   ;;  %s1866_s4 = inlined_call_operand.vmem [shape: f32[1,32], index: 4, kind: input, shape index: {}]   ;;  %s1867_s5 = inlined_call_operand.vmem [shape: bf16[48,128], index: 5, kind: input, shape index: {}]   ;;  %s1868_s6 = inlined_call_operand.vmem [shape: bf16[32,128], index: 6, kind: input, shape index: {}]   ;;  %s1869_s7 = inlined_call_operand.vmem [shape: f32[1,128], index: 7, kind: input, shape index: {}]   ;;  %s1870_s8 = inlined_call_operand.vmem [shape: f32[8,2,128], index: 8, kind: output, shape index: {}]  }
   0x1   :  { %s1610_s29 = smov 0  }
   0x2 LB: > { %s27_s30 = sadd.s32 1, %s1548_s28  ;;  %p1350_p0 = scmp.ge.s32.totalorder %s1552_s29, 1  ;;  %s1552_s29 = sphi %s1610_s29, %s18_s29   ;;  %s1548_s28 = sphi %s1608_s28, %s1872_s28   ;;  %s1544_s27 = sphi %s1606_s27, %s1871_s27  }
   0x3   : > { %p28_p1 = scmp.ge.s32.totalorder %s27_s30, 2  ;;  %p303_p2 = scmp.lt.s32.totalorder %s1552_s29, 3 }
   0x5   : > { %s1874_s30 = smov (%p28_p1, %s27_s30), 0  ;;  %p304_p3 = pnand %p1350_p0, %p303_p2 }
   0x6   : > { %s1351_s9 = sshll.u32 (!%p304_p3), %s1544_s27, 2  ;;  %p1354_p5 = scmp.ne.s32.totalorder (!%p304_p3), %s1544_s27, 0 }
   0x7   : > { %307 = sbr.rel (%p304_p3) target bundleno = 5646 (0x160e), region = 52  ;;  %p365_p4 = scmp.lt.s32.totalorder (!%p304_p3), %s1351_s9, 7 }
   0xc   : > { %s1876_s9 = smov (!%p365_p4, %s1351_s9), 7  ;;  %385 = sbr.rel (%p1354_p5) target bundleno = 20 (0x14), region = 56 }
   0xd   : > { %s1627_s12 = scalar_lea.vmem %s1864_s2, %s1876_s9  ;;  %s1353_s13 = sshll.u32 %s1876_s9, 1 }
   0xe   : > { %s1632_s16 = scalar_lea.vmem %s1870_s8, %s1353_s13 }
  0x11   : > { %vm386_vm0 = vcmask 254976   ;;  %v1554_v0 = vmov 0.0  }
  0x12   : > { %387 = vst.msk [vmem:[#allocation2] sm:$0x3] %vm386_vm0, %v1554_v0 }
  0x13   : > { %388 = vst.msk [vmem:[#allocation3] sm:$0x3] %vm386_vm0, %v1554_v0 }
  0x14 PF: > { %v1637_v1 = vld [vmem:[%s1865_s3 + $0x8] sm:$0xff]  ;;  %v1643_v2 = vld [vmem:[%s1865_s3] sm:$0xff]  ;;  %vm428_vm1 = vcmask 261120   ;;  %v468_v23 = vlaneseq  ;;  %vm472_vm2 = vcmask 1041409   ;;  %vm475_vm3 = vcmask 58368   ;;  %s1556_s25 = smov 16  }
  0x15   : > { %438 = vmatpush.bf16.msra.mxu0 %v1637_v1  ;;  %670 = vmatpush.bf16.msra.mxu3 %v1637_v1  ;;  %v1415_v5 = vld [vmem:[%s1862_s0] sm:$0xff]   ;;  %v1555_v30 = vmov 0   ;;  %v1687_v52 = vld [vmem:[%s1867_s5 + $0x10] sm:$0xff]  ;;  %v1694_v53 = vld [vmem:[%s1867_s5 + $0x8] sm:$0xff]  ;;  %s1557_s14 = smov 32   ;;  %vm525_vm4 = vcmask 130048  }
  0x16   : > { %v1658_v6 = vunpack.c.l.bf16 %v1415_v5  ;;  %v1660_v8 = vunpack.c.h.bf16 %v1415_v5  ;;  %v1667_v15 = vld [vmem:[%s1866_s4] ss:$0 sm:$0xff]  ;;  %v1673_v24 = vand.u32 127, %v468_v23  ;;  %1454 = vset.pattern.permute.xlu2 %v1555_v30  ;;  %1453 = vset.pattern.permute.xlu1 %v1555_v30  ;;  %vm570_vm5 = vcmask 392192   ;;  %s1558_s18 = smov 64  }
  0x17   : > { %1455 = vset.pattern.permute.xlu0 %v1555_v30  ;;  %579 = vmatpush.bf16.msra.mxu1 %v1687_v52  ;;  %v1701_v54 = vld [vmem:[%s1867_s5] sm:$0xff] }
  0x18   : > { %v1419_v56 = vld [vmem:[%s1863_s1] sm:$0xff]  }
  0x19   : > { %v1645_v3 = vld [vmem:[#allocation2] sm:$0x3]  ;;  %439 = vmatpush.bf16.msra.mxu0 %v1643_v2  ;;  %671 = vmatpush.bf16.msra.mxu3 %v1643_v2  ;;  %v1712_v57 = vunpack.c.h.bf16 %v1419_v56  ;;  %v1714_v58 = vunpack.c.l.bf16 %v1419_v56 }
  0x1a   : > { %v415_v4 = vpack.c.bf16 %v1645_v3, %v1645_v3  ;;  %v414_v55 = vld [vmem:[#allocation3] sm:$0x3] }
  0x1b   : > { %580 = vmatpush.bf16.msra.mxu1 %v1694_v53 }
  0x1c   : > { %1363 = vmatmul.msk.bf16.vlgmr.msra.gmra.mxu0 %vm428_vm1, %v415_v4 }
  0x1d   : > { %858 = vmatpush.bf16.msrb.mxu3 %v1637_v1  ;;  %785 = vmatpush.bf16.msrb.mxu0 %v1687_v52 }
  0x1f   : > { %581 = vmatpush.bf16.msra.mxu1 %v1701_v54 }
  0x21   : > { %859 = vmatpush.bf16.msrb.mxu3 %v1643_v2  ;;  %786 = vmatpush.bf16.msrb.mxu0 %v1694_v53 }
  0x23   : > { %973 = vmatpush.bf16.msrb.mxu1 %v1687_v52 }
  0x25   : > { %787 = vmatpush.bf16.msrb.mxu0 %v1701_v54 }
  0x27   : > { %974 = vmatpush.bf16.msrb.mxu1 %v1694_v53 }
  0x2b   : > { %975 = vmatpush.bf16.msrb.mxu1 %v1701_v54 }
  0x99   : > { %v441_v7 = vpop.f32.mrf.mxu0 }
  0x9a   : > { %v446_v9 = vrot.slane %v441_v7, 1  ;;  %v447_v10 = vperm.slane %v441_v7, 0 }
  0x9c   : > { %v448_v11 = vperm.slane %v446_v9, 0  ;;  %v451_v12 = vadd.f32 %v1658_v6, %v447_v10 }
  0x9e   : > { %v452_v13 = vadd.f32 %v1660_v8, %v448_v11  ;;  %1458 = vtanh.f32 %v451_v12 }
  0xa0   : > { %1460 = vtanh.f32 %v452_v13 }
  0xa1   : > { %v443_v14 = vpop.f32.mrf.mxu0 }
  0xa4   : > { %v1459_v16 = vpop.eup %1458 }
  0xa5   : > { %v458_v17 = vmul.f32 %v1459_v16, %v1667_v15 }
  0xa6   : > { %v1461_v19 = vpop.eup %1460 }
  0xa7   : > { %v460_v18 = vsel %vm428_vm1, %v458_v17, 0.0  ;;  %v459_v20 = vmul.f32 %v1461_v19, %v1667_v15 }
  0xa8   : > { %461 = vadd.xlane.f32.xlu0 %v460_v18 }
  0xa9   : > { %v463_v21 = vsel %vm428_vm1, %v459_v20, 0.0 }
  0xb0   : > { %464 = vadd.xlane.f32.xlu0 %v463_v21 }
 0x11b   : > { %v462_v22 = vpop.xlane.xlu0 %461 }
 0x11c   : > { %v470_v26 = vperm.slane %v462_v22, %v1673_v24 }
 0x123   : > { %v465_v25 = vpop.xlane.xlu0 %464 }
 0x124   : > { %v471_v27 = vperm.slane %v465_v25, %v1673_v24 }
 0x126   : > { %v473_v28 = vsel %vm472_vm2, %v471_v27, %v470_v26 }
 0x127   : > { %v476_v29 = vsel %vm475_vm3, %v473_v28, -inf }
 0x128   : > { %477 = vmax.xlane.f32.xlu1 %v476_v29 }
 0x19b   : > { %v478_v31 = vpop.xlane.xlu1 %477 }
 0x19c   : > { %v480_v32 = vperm.slane %v478_v31, 0  ;;  %v481_v33 = vperm.slane %v478_v31, 1 }
 0x19e   : > { %v484_v34 = vsub.f32 %v462_v22, %v480_v32  ;;  %v485_v35 = vsub.f32 %v465_v25, %v481_v33  ;;  %v550_v22 = vld [vmem:[%s1627_s12] sm:$0x1] }
 0x19f   : > { %v551_v23 = vunpack.c.l.bf16 %v550_v22 }
 0x1a0   : > { %v486_v36 = vmul.f32 1.442695, %v484_v34  ;;  %v488_v37 = vmul.f32 1.442695, %v485_v35 }
 0x1a2   : > { %1462 = vpow2.f32 %v486_v36 }
 0x1a3   : > { %1464 = vpow2.f32 %v488_v37 }
 0x1a8   : > { %v1463_v38 = vpop.eup %1462 }
 0x1a9   : > { %v1465_v39 = vpop.eup %1464  ;;  %493 = vperm.xlu1 %1453, %v1463_v38  }
 0x1aa   : > { %496 = vperm.xlu2 %1454, %v1465_v39  }
 0x204   : > { %v497_v40 = vpop.permute.xlu2 %496 }
 0x205   : > { %v499_v42 = vperm.slane %v497_v40, %v1673_v24 }
 0x21b   : > { %v494_v41 = vpop.permute.xlu1 %493 }
 0x21c   : > { %v498_v43 = vperm.slane %v494_v41, %v1673_v24 }
 0x21e   : > { %v500_v44 = vsel %vm472_vm2, %v499_v42, %v498_v43 }
 0x21f   : > { %v502_v45 = vsel %vm475_vm3, %v500_v44, 0.0 }
 0x220   : > { %503 = vadd.xlane.f32.xlu2 %v502_v45 }
 0x238   : > { %608 = vrot.lane.b32.xlu2 %v414_v55, %s1557_s14 }
 0x293   : > { %v504_v46 = vpop.xlane.xlu2 %503 }
 0x294   : > { %1466 = vrcp.f32 %v504_v46 }
 0x29a   : > { %v1467_v47 = vpop.eup %1466 }
 0x29b   : > { %v508_v48 = vperm.slane %v1467_v47, 1  ;;  %v507_v49 = vperm.slane %v1467_v47, 0  ;;  %v609_v44 = vpop.permute.xlu2 %608 }
 0x29d   : > { %v512_v50 = vmul.f32 %v1465_v39, %v508_v48  ;;  %v511_v51 = vmul.f32 %v1463_v38, %v507_v49  ;;  %v1413_v49 = vld [vmem:[%s1868_s6 + $0x8] sm:$0xff] }
 0x29e   : > { %656 = vmatpush.bf16.msra.mxu2 %v1413_v49  ;;  %1031 = vmatpush.bf16.msra.mxu0 %v1413_v49 }
 0x29f   : > { %520 = vperm.xlu1 %1453, %v512_v50   ;;  %515 = vperm.xlu0 %1455, %v511_v51   ;;  %v1412_v50 = vld [vmem:[%s1868_s6] sm:$0xff] }
 0x2a2   : > { %657 = vmatpush.bf16.msra.mxu2 %v1412_v50  ;;  %1032 = vmatpush.bf16.msra.mxu0 %v1412_v50 }
 0x2a6   : > { %843 = vmatpush.bf16.msrb.mxu2 %v1413_v49 }
 0x2a7   : > { %545 = vrot.lane.b32.xlu1 %v1645_v3, %s1556_s25  ;;  %s1559_s25 = smov 48  }
 0x2aa   : > { %844 = vmatpush.bf16.msrb.mxu2 %v1412_v50 }
 0x311   : > { %v521_v59 = vpop.permute.xlu1 %520  ;;  %v516_v60 = vpop.permute.xlu0 %515 }
 0x312   : > { %v524_v61 = vmul.f32 %v1712_v57, %v521_v59  ;;  %v523_v62 = vmul.f32 %v1714_v58, %v516_v60  ;;  %v1747_v60 = vld [vmem:[%s1869_s7] ss:$0 sm:$0xff] }
 0x314   : > { %v533_v63 = vsel %vm525_vm4, %v524_v61, 0.0  ;;  %v526_v0 = vsel %vm525_vm4, %v523_v62, 0.0 }
 0x315   : > { %v534_v3 = vrot.slane %v533_v63, 4  ;;  %v527_v4 = vrot.slane %v526_v0, 4 }
 0x317   : > { %v535_v5 = vadd.f32 %v534_v3, %v533_v63  ;;  %v528_v7 = vadd.f32 %v527_v4, %v526_v0 }
 0x319   : > { %v536_v9 = vrot.slane %v535_v5, 2  ;;  %v529_v10 = vrot.slane %v528_v7, 2  ;;  %v546_v18 = vpop.permute.xlu1 %545 }
 0x31b   : > { %v537_v11 = vadd.f32 %v536_v9, %v535_v5  ;;  %v530_v12 = vadd.f32 %v529_v10, %v528_v7 }
 0x31d   : > { %v538_v13 = vrot.slane %v537_v11, 1  ;;  %v531_v14 = vrot.slane %v530_v12, 1 }
 0x31f   : > { %v539_v16 = vadd.f32 %v538_v13, %v537_v11  ;;  %v532_v17 = vadd.f32 %v531_v14, %v530_v12 }
 0x321   : > { %v542_v19 = vsel %vm472_vm2, %v539_v16, %v532_v17 }
 0x322   : > { %v548_v20 = vsel %vm525_vm4, %v542_v19, %v546_v18 }
 0x323   : > { %v549_v21 = vpack.c.bf16 %v548_v20, %v548_v20 }
 0x325   : > { %1376 = vmatmul.msk.bf16.vlgmr.msra.gmra.mxu1 %vm570_vm5, %v549_v21 }
 0x326   : > { %1219 = vmatpush.bf16.msra.mxu1 %v1413_v49 }
 0x32a   : > { %1220 = vmatpush.bf16.msra.mxu1 %v1412_v50 }
 0x3a2   : > { %v583_v25 = vpop.f32.mrf.mxu1 }
 0x3a3   : > { %v584_v26 = vadd.f32 %v583_v25, %v551_v23 }
 0x3a5   : > { %1468 = vtanh.f32 %v584_v26  ;;  %v1377_v29 = vmul.f32 -1.442695, %v584_v26 }
 0x3a7   : > { %1470 = vpow2.f32 %v1377_v29 }
 0x3aa   : > { %v585_v27 = vpop.f32.mrf.mxu1 }
 0x3ab   : > { %v1469_v28 = vpop.eup %1468 }
 0x3ac   : > { %613 = vrot.lane.b32.xlu1 %v1469_v28, %s1558_s18 }
 0x3ad   : > { %v1471_v30 = vpop.eup %1470 }
 0x3ae   : > { %v590_v31 = vadd.f32 1.0, %v1471_v30 }
 0x3b0   : > { %1472 = vrcp.f32 %v590_v31  ;;  %v602_v37 = vand.u32 2147483648, %v590_v31  ;;  %vm596_vm7 = vweird.f32 %v590_v31  ;;  %v600_v38 = vand.u32 2147483647, %v590_v31 }
 0x3b2   : > { %v603_v40 = vor.u32 1.1754944e-38, %v602_v37  ;;  %vm601_vm9 = vcmp.eq.f32.partialorder %v600_v38, 8.507059e+37 }
 0x3b6   : > { %v1473_v32 = vpop.eup %1472 }
 0x3b7   : > { %v592_v33 = vmul.f32 %v1473_v32, %v590_v31  ;;  %vm597_vm6 = vweird.f32 %v1473_v32 }
 0x3b8   : > { %vm598_vm8 = vmor %vm596_vm7, %vm597_vm6  ;;  %vm1232_vm7 = vcmask 254976  }
 0x3b9   : > { %v593_v34 = vsub.f32 1.0, %v592_v33 }
 0x3bb   : > { %v594_v35 = vmul.f32 %v1473_v32, %v593_v34 }
 0x3bd   : > { %v595_v36 = vadd.f32 %v1473_v32, %v594_v35 }
 0x3bf   : > { %v599_v39 = vsel %vm598_vm8, %v1473_v32, %v595_v36 }
 0x3c0   : > { %v604_v41 = vsel %vm601_vm9, %v603_v40, %v599_v39 }
 0x3c1   : > { %v611_v45 = vmul.f32 %v609_v44, %v604_v41 }
 0x41e   : > { %v614_v42 = vpop.permute.xlu1 %613 }
 0x41f   : > { %v616_v43 = vmul.f32 %v614_v42, %v604_v41 }
 0x421   : > { %618 = vrot.lane.b32.xlu0 %v616_v43, %s1557_s14 }
 0x493   : > { %v619_v46 = vpop.permute.xlu0 %618 }
 0x494   : > { %v1726_v47 = vadd.f32 %v619_v46, %v611_v45 }
 0x496   : > { %1474 = vtanh.f32 %v1726_v47 }
 0x49c   : > { %v1475_v48 = vpop.eup %1474 }
 0x49d   : > { %624 = vrot.lane.b32.xlu1 %v1475_v48, %s1558_s18 }
 0x50f   : > { %v625_v51 = vpop.permute.xlu1 %624 }
 0x510   : > { %v627_v55 = vmul.f32 %v625_v51, %v604_v41 }
 0x512   : > { %v628_v56 = vpack.c.bf16 %v627_v55, %v627_v55 }
 0x514   : > { %633 = vrot.lane.b32.xlu0 %v628_v56, %s1557_s14 }
 0x586   : > { %v634_v59 = vpop.permute.xlu0 %633 }
 0x587   : > { %1386 = vmatmul.msk.bf16.vlgmr.msra.gmra.mxu2 %vm428_vm1, %v634_v59  ;;  %1387 = vmatmul.msk.bf16.vlgmr.msra.gmra.mxu3 %vm428_vm1, %v634_v59 }
 0x588   : > { %1046 = vmatpush.bf16.msra.mxu2 %v1637_v1  ;;  %1161 = vmatpush.bf16.msra.mxu3 %v1687_v52 }
 0x58c   : > { %1047 = vmatpush.bf16.msra.mxu2 %v1643_v2  ;;  %1162 = vmatpush.bf16.msra.mxu3 %v1694_v53 }
 0x590   : > { %1163 = vmatpush.bf16.msra.mxu3 %v1701_v54 }
 0x60a   : > { %v659_v61 = vpop.f32.mrf.mxu2  ;;  %v673_v62 = vpop.f32.mrf.mxu3 }
 0x60b   : > { %v660_v63 = vadd.f32 %v1747_v60, %v659_v61  ;;  %v678_v0 = vrot.slane %v673_v62, 1  ;;  %v679_v3 = vperm.slane %v673_v62, 0 }
 0x60d   : > { %663 = vst [vmem:[%s1632_s16] sm:$0x3] %v660_v63  ;;  %v680_v1 = vperm.slane %v678_v0, 0  ;;  %v683_v52 = vadd.f32 %v1658_v6, %v679_v3 }
 0x60f   : > { %v684_v2 = vadd.f32 %v1660_v8, %v680_v1  ;;  %1476 = vtanh.f32 %v683_v52 }
 0x611   : > { %1478 = vtanh.f32 %v684_v2 }
 0x612   : > { %v661_v53 = vpop.f32.mrf.mxu2  ;;  %v675_v54 = vpop.f32.mrf.mxu3 }
 0x613   : > { %v1388_v54 = vld [vmem:[%s1627_s12 + $0x1] sm:$0x1] }
 0x615   : > { %v1477_v4 = vpop.eup %1476 }
 0x616   : > { %v687_v5 = vmul.f32 %v1477_v4, %v1667_v15  ;;  %v776_v4 = vunpack.c.l.bf16 %v1388_v54 }
 0x617   : > { %v1479_v7 = vpop.eup %1478 }
 0x618   : > { %v689_v9 = vsel %vm428_vm1, %v687_v5, 0.0  ;;  %v688_v10 = vmul.f32 %v1479_v7, %v1667_v15 }
 0x619   : > { %690 = vadd.xlane.f32.xlu1 %v689_v9 }
 0x61a   : > { %v692_v11 = vsel %vm428_vm1, %v688_v10, 0.0 }
 0x61b   : > { %693 = vadd.xlane.f32.xlu0 %v692_v11 }
 0x68c   : > { %v691_v12 = vpop.xlane.xlu1 %690 }
 0x68d   : > { %v697_v14 = vperm.slane %v691_v12, %v1673_v24 }
 0x68e   : > { %v694_v13 = vpop.xlane.xlu0 %693 }
 0x68f   : > { %v698_v16 = vperm.slane %v694_v13, %v1673_v24 }
 0x691   : > { %v699_v17 = vsel %vm472_vm2, %v698_v16, %v697_v14 }
 0x692   : > { %v701_v18 = vsel %vm475_vm3, %v699_v17, -inf }
 0x693   : > { %702 = vmax.xlane.f32.xlu2 %v701_v18 }
 0x706   : > { %v703_v19 = vpop.xlane.xlu2 %702 }
 0x707   : > { %v705_v20 = vperm.slane %v703_v19, 0  ;;  %v706_v21 = vperm.slane %v703_v19, 1 }
 0x709   : > { %v709_v22 = vsub.f32 %v691_v12, %v705_v20  ;;  %v710_v23 = vsub.f32 %v694_v13, %v706_v21 }
 0x70b   : > { %v711_v25 = vmul.f32 1.442695, %v709_v22  ;;  %v713_v26 = vmul.f32 1.442695, %v710_v23 }
 0x70d   : > { %1480 = vpow2.f32 %v711_v25 }
 0x70e   : > { %1482 = vpow2.f32 %v713_v26 }
 0x713   : > { %v1481_v27 = vpop.eup %1480 }
 0x714   : > { %v1483_v28 = vpop.eup %1482  ;;  %718 = vperm.xlu1 %1453, %v1481_v27  }
 0x715   : > { %721 = vperm.xlu0 %1455, %v1483_v28  }
 0x71d   : > { %769 = vrot.lane.b32.xlu0 %v627_v55, %s1559_s25 }
 0x786   : > { %v719_v29 = vpop.permute.xlu1 %718 }
 0x787   : > { %v722_v30 = vpop.permute.xlu0 %721  ;;  %v723_v31 = vperm.slane %v719_v29, %v1673_v24 }
 0x788   : > { %v724_v32 = vperm.slane %v722_v30, %v1673_v24 }
 0x78a   : > { %v725_v33 = vsel %vm472_vm2, %v724_v32, %v723_v31 }
 0x78b   : > { %v727_v34 = vsel %vm475_vm3, %v725_v33, 0.0 }
 0x78c   : > { %728 = vadd.xlane.f32.xlu2 %v727_v34 }
 0x78f   : > { %v770_v1 = vpop.permute.xlu0 %769 }
 0x7ff   : > { %v729_v35 = vpop.xlane.xlu2 %728 }
 0x800   : > { %1484 = vrcp.f32 %v729_v35 }
 0x806   : > { %v1485_v36 = vpop.eup %1484 }
 0x807   : > { %v733_v37 = vperm.slane %v1485_v36, 1  ;;  %v732_v38 = vperm.slane %v1485_v36, 0 }
 0x809   : > { %v737_v39 = vmul.f32 %v1483_v28, %v733_v37  ;;  %v736_v40 = vmul.f32 %v1481_v27, %v732_v38 }
 0x80b   : > { %745 = vperm.xlu1 %1453, %v737_v39   ;;  %740 = vperm.xlu2 %1454, %v736_v40  }
 0x865   : > { %v741_v41 = vpop.permute.xlu2 %740 }
 0x866   : > { %v748_v42 = vmul.f32 %v1714_v58, %v741_v41 }
 0x868   : > { %v750_v43 = vsel %vm525_vm4, %v748_v42, 0.0 }
 0x869   : > { %v751_v44 = vrot.slane %v750_v43, 4 }
 0x86b   : > { %v752_v45 = vadd.f32 %v751_v44, %v750_v43 }
 0x86d   : > { %v753_v49 = vrot.slane %v752_v45, 2 }
 0x86f   : > { %v754_v55 = vadd.f32 %v753_v49, %v752_v45 }
 0x871   : > { %v755_v61 = vrot.slane %v754_v55, 1 }
 0x873   : > { %v756_v0 = vadd.f32 %v755_v61, %v754_v55 }
 0x87d   : > { %v746_v46 = vpop.permute.xlu1 %745 }
 0x87e   : > { %v749_v48 = vmul.f32 %v1712_v57, %v746_v46 }
 0x880   : > { %v757_v50 = vsel %vm525_vm4, %v749_v48, 0.0 }
 0x881   : > { %v758_v51 = vrot.slane %v757_v50, 4 }
 0x883   : > { %v759_v56 = vadd.f32 %v758_v51, %v757_v50 }
 0x885   : > { %v760_v59 = vrot.slane %v759_v56, 2 }
 0x887   : > { %v761_v62 = vadd.f32 %v760_v59, %v759_v56 }
 0x889   : > { %v762_v63 = vrot.slane %v761_v62, 1 }
 0x88b   : > { %v763_v3 = vadd.f32 %v762_v63, %v761_v62 }
 0x88d   : > { %v766_v52 = vsel %vm472_vm2, %v763_v3, %v756_v0 }
 0x88e   : > { %v772_v2 = vsel %vm525_vm4, %v766_v52, %v770_v1 }
 0x88f   : > { %v773_v53 = vpack.c.bf16 %v772_v2, %v772_v2 }
 0x891   : > { %1389 = vmatmul.msk.bf16.vlgmr.msrb.gmra.mxu0 %vm570_vm5, %v773_v53 }
 0x90e   : > { %v789_v5 = vpop.f32.mrf.mxu0 }
 0x90f   : > { %v790_v7 = vadd.f32 %v789_v5, %v776_v4 }
 0x911   : > { %1486 = vtanh.f32 %v790_v7  ;;  %v1390_v11 = vmul.f32 -1.442695, %v790_v7 }
 0x913   : > { %1488 = vpow2.f32 %v1390_v11 }
 0x916   : > { %v791_v9 = vpop.f32.mrf.mxu0 }
 0x917   : > { %v1487_v10 = vpop.eup %1486 }
 0x918   : > { %815 = vrot.lane.b32.xlu1 %v1487_v10, %s1558_s18 }
 0x919   : > { %v1489_v12 = vpop.eup %1488 }
 0x91a   : > { %v796_v13 = vadd.f32 1.0, %v1489_v12 }
 0x91c   : > { %1490 = vrcp.f32 %v796_v13  ;;  %v808_v20 = vand.u32 2147483648, %v796_v13  ;;  %vm802_vm11 = vweird.f32 %v796_v13  ;;  %v806_v21 = vand.u32 2147483647, %v796_v13 }
 0x91e   : > { %v809_v23 = vor.u32 1.1754944e-38, %v808_v20  ;;  %vm807_vm13 = vcmp.eq.f32.partialorder %v806_v21, 8.507059e+37 }
 0x922   : > { %v1491_v14 = vpop.eup %1490 }
 0x923   : > { %v798_v16 = vmul.f32 %v1491_v14, %v796_v13  ;;  %vm803_vm10 = vweird.f32 %v1491_v14 }
 0x924   : > { %vm804_vm12 = vmor %vm802_vm11, %vm803_vm10 }
 0x925   : > { %v799_v17 = vsub.f32 1.0, %v798_v16 }
 0x927   : > { %v800_v18 = vmul.f32 %v1491_v14, %v799_v17 }
 0x929   : > { %v801_v19 = vadd.f32 %v1491_v14, %v800_v18 }
 0x92b   : > { %v805_v22 = vsel %vm804_vm12, %v1491_v14, %v801_v19 }
 0x92c   : > { %v810_v26 = vsel %vm807_vm13, %v809_v23, %v805_v22 }
 0x92d   : > { %v813_v28 = vmul.f32 %v810_v26, %v1726_v47 }
 0x98a   : > { %v816_v25 = vpop.permute.xlu1 %815 }
 0x98b   : > { %v818_v27 = vmul.f32 %v816_v25, %v810_v26 }
 0x98d   : > { %820 = vrot.lane.b32.xlu0 %v818_v27, %s1557_s14 }
 0x9ff   : > { %v821_v29 = vpop.permute.xlu0 %820 }
 0xa00   : > { %v1777_v30 = vadd.f32 %v821_v29, %v813_v28 }
 0xa02   : > { %1492 = vtanh.f32 %v1777_v30 }
 0xa08   : > { %v1493_v31 = vpop.eup %1492 }
 0xa09   : > { %826 = vrot.lane.b32.xlu2 %v1493_v31, %s1558_s18 }
 0xa63   : > { %v827_v32 = vpop.permute.xlu2 %826 }
 0xa64   : > { %v829_v33 = vmul.f32 %v827_v32, %v810_v26 }
 0xa66   : > { %v830_v34 = vpack.c.bf16 %v829_v33, %v829_v33 }
 0xa68   : > { %832 = vrot.lane.b32.xlu1 %v830_v34, %s1557_s14 }
 0xada   : > { %v833_v35 = vpop.permute.xlu1 %832 }
 0xadb   : > { %1391 = vmatmul.msk.bf16.vlgmr.msrb.gmra.mxu2 %vm428_vm1, %v833_v35  ;;  %1393 = vmatmul.msk.bf16.vlgmr.msrb.gmra.mxu3 %vm428_vm1, %v833_v35 }
 0xb5e   : > { %v846_v47 = vpop.f32.mrf.mxu2  ;;  %v861_v36 = vpop.f32.mrf.mxu3 }
 0xb5f   : > { %v847_v37 = vadd.f32 %v1747_v60, %v846_v47  ;;  %v866_v38 = vrot.slane %v861_v36, 1  ;;  %v867_v39 = vperm.slane %v861_v36, 0 }
 0xb61   : > { %1392 = vst [vmem:[%s1632_s16 + $0x2] sm:$0x3] %v847_v37  ;;  %v868_v40 = vperm.slane %v866_v38, 0  ;;  %v871_v41 = vadd.f32 %v1658_v6, %v867_v39 }
 0xb63   : > { %v872_v42 = vadd.f32 %v1660_v8, %v868_v40  ;;  %1494 = vtanh.f32 %v871_v41 }
 0xb65   : > { %1496 = vtanh.f32 %v872_v42 }
 0xb66   : > { %v848_v43 = vpop.f32.mrf.mxu2  ;;  %v863_v44 = vpop.f32.mrf.mxu3 }
 0xb67   : > { %v1394_v44 = vld [vmem:[%s1627_s12 + $0x2] sm:$0x1] }
 0xb69   : > { %v1495_v45 = vpop.eup %1494 }
 0xb6a   : > { %v875_v46 = vmul.f32 %v1495_v45, %v1667_v15  ;;  %v964_v45 = vunpack.c.l.bf16 %v1394_v44 }
 0xb6b   : > { %v1497_v48 = vpop.eup %1496 }
 0xb6c   : > { %v877_v49 = vsel %vm428_vm1, %v875_v46, 0.0  ;;  %v876_v50 = vmul.f32 %v1497_v48, %v1667_v15 }
 0xb6d   : > { %878 = vadd.xlane.f32.xlu0 %v877_v49 }
 0xb6e   : > { %v880_v51 = vsel %vm428_vm1, %v876_v50, 0.0 }
 0xb6f   : > { %881 = vadd.xlane.f32.xlu2 %v880_v51 }
 0xbe0   : > { %v879_v55 = vpop.xlane.xlu0 %878 }
 0xbe1   : > { %v885_v59 = vperm.slane %v879_v55, %v1673_v24 }
 0xbe2   : > { %v882_v56 = vpop.xlane.xlu2 %881 }
 0xbe3   : > { %v886_v61 = vperm.slane %v882_v56, %v1673_v24 }
 0xbe5   : > { %v887_v62 = vsel %vm472_vm2, %v886_v61, %v885_v59 }
 0xbe6   : > { %v889_v63 = vsel %vm475_vm3, %v887_v62, -inf }
 0xbe7   : > { %890 = vmax.xlane.f32.xlu1 %v889_v63 }
 0xc5a   : > { %v891_v0 = vpop.xlane.xlu1 %890 }
 0xc5b   : > { %v893_v3 = vperm.slane %v891_v0, 0  ;;  %v894_v1 = vperm.slane %v891_v0, 1 }
 0xc5d   : > { %v897_v52 = vsub.f32 %v879_v55, %v893_v3  ;;  %v898_v2 = vsub.f32 %v882_v56, %v894_v1 }
 0xc5f   : > { %v899_v53 = vmul.f32 1.442695, %v897_v52  ;;  %v901_v54 = vmul.f32 1.442695, %v898_v2 }
 0xc61   : > { %1498 = vpow2.f32 %v899_v53 }
 0xc62   : > { %1500 = vpow2.f32 %v901_v54 }
 0xc67   : > { %v1499_v4 = vpop.eup %1498 }
 0xc68   : > { %v1501_v5 = vpop.eup %1500  ;;  %906 = vperm.xlu0 %1455, %v1499_v4  }
 0xc69   : > { %909 = vperm.xlu2 %1454, %v1501_v5  }
 0xc71   : > { %957 = vrot.lane.b32.xlu2 %v829_v33, %s1559_s25 }
 0xcc3   : > { %v910_v7 = vpop.permute.xlu2 %909 }
 0xcc4   : > { %v912_v10 = vperm.slane %v910_v7, %v1673_v24 }
 0xccb   : > { %v958_v40 = vpop.permute.xlu2 %957 }
 0xcda   : > { %v907_v9 = vpop.permute.xlu0 %906 }
 0xcdb   : > { %v911_v11 = vperm.slane %v907_v9, %v1673_v24 }
 0xcdd   : > { %v913_v12 = vsel %vm472_vm2, %v912_v10, %v911_v11 }
 0xcde   : > { %v915_v13 = vsel %vm475_vm3, %v913_v12, 0.0 }
 0xcdf   : > { %916 = vadd.xlane.f32.xlu1 %v915_v13 }
 0xd52   : > { %v917_v14 = vpop.xlane.xlu1 %916 }
 0xd53   : > { %1502 = vrcp.f32 %v917_v14 }
 0xd59   : > { %v1503_v16 = vpop.eup %1502 }
 0xd5a   : > { %v921_v17 = vperm.slane %v1503_v16, 1  ;;  %v920_v18 = vperm.slane %v1503_v16, 0 }
 0xd5c   : > { %v925_v19 = vmul.f32 %v1501_v5, %v921_v17  ;;  %v924_v20 = vmul.f32 %v1499_v4, %v920_v18 }
 0xd5e   : > { %933 = vperm.xlu0 %1455, %v925_v19   ;;  %928 = vperm.xlu1 %1453, %v924_v20  }
 0xdd0   : > { %v934_v21 = vpop.permute.xlu0 %933  ;;  %v929_v22 = vpop.permute.xlu1 %928 }
 0xdd1   : > { %v937_v23 = vmul.f32 %v1712_v57, %v934_v21  ;;  %v936_v25 = vmul.f32 %v1714_v58, %v929_v22 }
 0xdd3   : > { %v945_v26 = vsel %vm525_vm4, %v937_v23, 0.0  ;;  %v938_v27 = vsel %vm525_vm4, %v936_v25, 0.0 }
 0xdd4   : > { %v946_v28 = vrot.slane %v945_v26, 4  ;;  %v939_v29 = vrot.slane %v938_v27, 4 }
 0xdd6   : > { %v947_v31 = vadd.f32 %v946_v28, %v945_v26  ;;  %v940_v32 = vadd.f32 %v939_v29, %v938_v27 }
 0xdd8   : > { %v948_v33 = vrot.slane %v947_v31, 2  ;;  %v941_v34 = vrot.slane %v940_v32, 2 }
 0xdda   : > { %v949_v35 = vadd.f32 %v948_v33, %v947_v31  ;;  %v942_v47 = vadd.f32 %v941_v34, %v940_v32 }
 0xddc   : > { %v950_v36 = vrot.slane %v949_v35, 1  ;;  %v943_v37 = vrot.slane %v942_v47, 1 }
 0xdde   : > { %v951_v38 = vadd.f32 %v950_v36, %v949_v35  ;;  %v944_v39 = vadd.f32 %v943_v37, %v942_v47 }
 0xde0   : > { %v954_v41 = vsel %vm472_vm2, %v951_v38, %v944_v39 }
 0xde1   : > { %v960_v42 = vsel %vm525_vm4, %v954_v41, %v958_v40 }
 0xde2   : > { %v961_v43 = vpack.c.bf16 %v960_v42, %v960_v42 }
 0xde4   : > { %1395 = vmatmul.msk.bf16.vlgmr.msrb.gmra.mxu1 %vm570_vm5, %v961_v43 }
 0xe61   : > { %v977_v46 = vpop.f32.mrf.mxu1 }
 0xe62   : > { %v978_v48 = vadd.f32 %v977_v46, %v964_v45 }
 0xe64   : > { %1504 = vtanh.f32 %v978_v48  ;;  %v1396_v51 = vmul.f32 -1.442695, %v978_v48 }
 0xe66   : > { %1506 = vpow2.f32 %v1396_v51 }
 0xe69   : > { %v979_v49 = vpop.f32.mrf.mxu1 }
 0xe6a   : > { %v1505_v50 = vpop.eup %1504 }
 0xe6b   : > { %1003 = vrot.lane.b32.xlu0 %v1505_v50, %s1558_s18 }
 0xe6c   : > { %v1507_v55 = vpop.eup %1506 }
 0xe6d   : > { %v984_v56 = vadd.f32 1.0, %v1507_v55 }
 0xe6f   : > { %1508 = vrcp.f32 %v984_v56  ;;  %v996_v3 = vand.u32 2147483648, %v984_v56  ;;  %vm990_vm15 = vweird.f32 %v984_v56  ;;  %v994_v1 = vand.u32 2147483647, %v984_v56 }
 0xe71   : > { %v997_v2 = vor.u32 1.1754944e-38, %v996_v3  ;;  %vm995_vm6 = vcmp.eq.f32.partialorder %v994_v1, 8.507059e+37 }
 0xe75   : > { %v1509_v59 = vpop.eup %1508 }
 0xe76   : > { %v986_v61 = vmul.f32 %v1509_v59, %v984_v56  ;;  %vm991_vm14 = vweird.f32 %v1509_v59 }
 0xe77   : > { %vm992_vm0 = vmor %vm990_vm15, %vm991_vm14 }
 0xe78   : > { %v987_v62 = vsub.f32 1.0, %v986_v61 }
 0xe7a   : > { %v988_v63 = vmul.f32 %v1509_v59, %v987_v62 }
 0xe7c   : > { %v989_v0 = vadd.f32 %v1509_v59, %v988_v63 }
 0xe7e   : > { %v993_v52 = vsel %vm992_vm0, %v1509_v59, %v989_v0 }
 0xe7f   : > { %v998_v54 = vsel %vm995_vm6, %v997_v2, %v993_v52 }
 0xe80   : > { %v1001_v5 = vmul.f32 %v998_v54, %v1777_v30 }
 0xedd   : > { %v1004_v53 = vpop.permute.xlu0 %1003 }
 0xede   : > { %v1006_v4 = vmul.f32 %v1004_v53, %v998_v54 }
 0xee0   : > { %1008 = vrot.lane.b32.xlu2 %v1006_v4, %s1557_s14 }
 0xf3a   : > { %v1009_v7 = vpop.permute.xlu2 %1008 }
 0xf3b   : > { %v1812_v9 = vadd.f32 %v1009_v7, %v1001_v5 }
 0xf3d   : > { %1510 = vtanh.f32 %v1812_v9 }
 0xf43   : > { %v1511_v10 = vpop.eup %1510 }
 0xf44   : > { %1014 = vrot.lane.b32.xlu0 %v1511_v10, %s1558_s18 }
 0xfb6   : > { %v1015_v11 = vpop.permute.xlu0 %1014 }
 0xfb7   : > { %v1017_v12 = vmul.f32 %v1015_v11, %v998_v54 }
 0xfb9   : > { %v1018_v13 = vpack.c.bf16 %v1017_v12, %v1017_v12 }
 0xfbb   : > { %1020 = vrot.lane.b32.xlu1 %v1018_v13, %s1557_s14 }
0x102d   : > { %v1021_v14 = vpop.permute.xlu1 %1020 }
0x102e   : > { %1397 = vmatmul.msk.bf16.vlgmr.msra.gmra.mxu0 %vm428_vm1, %v1021_v14  ;;  %1399 = vmatmul.msk.bf16.vlgmr.msra.gmra.mxu2 %vm428_vm1, %v1021_v14 }
0x10ab   : > { %v1034_v16 = vpop.f32.mrf.mxu0 }
0x10ac   : > { %v1035_v30 = vadd.f32 %v1747_v60, %v1034_v16 }
0x10ae   : > { %1398 = vst [vmem:[%s1632_s16 + $0x4] sm:$0x3] %v1035_v30 }
0x10b1   : > { %v1049_v17 = vpop.f32.mrf.mxu2 }
0x10b2   : > { %v1054_v18 = vrot.slane %v1049_v17, 1  ;;  %v1055_v19 = vperm.slane %v1049_v17, 0 }
0x10b3   : > { %v1036_v20 = vpop.f32.mrf.mxu0 }
0x10b4   : > { %v1056_v21 = vperm.slane %v1054_v18, 0  ;;  %v1059_v22 = vadd.f32 %v1658_v6, %v1055_v19  ;;  %v1400_v18 = vld [vmem:[%s1627_s12 + $0x3] sm:$0x1]  ;;  %s1560_s12 = smov 96  }
0x10b5   : > { %v1152_v19 = vunpack.c.l.bf16 %v1400_v18 }
0x10b6   : > { %v1060_v23 = vadd.f32 %v1660_v8, %v1056_v21  ;;  %1512 = vtanh.f32 %v1059_v22 }
0x10b8   : > { %1514 = vtanh.f32 %v1060_v23 }
0x10b9   : > { %v1051_v25 = vpop.f32.mrf.mxu2 }
0x10bc   : > { %v1513_v26 = vpop.eup %1512 }
0x10bd   : > { %v1063_v27 = vmul.f32 %v1513_v26, %v1667_v15 }
0x10be   : > { %v1515_v28 = vpop.eup %1514 }
0x10bf   : > { %v1065_v29 = vsel %vm428_vm1, %v1063_v27, 0.0  ;;  %v1064_v31 = vmul.f32 %v1515_v28, %v1667_v15 }
0x10c0   : > { %1066 = vadd.xlane.f32.xlu2 %v1065_v29 }
0x10c1   : > { %v1068_v32 = vsel %vm428_vm1, %v1064_v31, 0.0 }
0x10c2   : > { %1069 = vadd.xlane.f32.xlu0 %v1068_v32 }
0x1133   : > { %v1067_v33 = vpop.xlane.xlu2 %1066 }
0x1134   : > { %v1073_v6 = vperm.slane %v1067_v33, %v1673_v24 }
0x1135   : > { %v1070_v34 = vpop.xlane.xlu0 %1069 }
0x1136   : > { %v1074_v8 = vperm.slane %v1070_v34, %v1673_v24 }
0x1138   : > { %v1075_v35 = vsel %vm472_vm2, %v1074_v8, %v1073_v6 }
0x1139   : > { %v1077_v47 = vsel %vm475_vm3, %v1075_v35, -inf }
0x113a   : > { %1078 = vmax.xlane.f32.xlu1 %v1077_v47 }
0x11ad   : > { %v1079_v36 = vpop.xlane.xlu1 %1078 }
0x11ae   : > { %v1081_v37 = vperm.slane %v1079_v36, 0  ;;  %v1082_v38 = vperm.slane %v1079_v36, 1 }
0x11b0   : > { %v1085_v39 = vsub.f32 %v1067_v33, %v1081_v37  ;;  %v1086_v15 = vsub.f32 %v1070_v34, %v1082_v38 }
0x11b2   : > { %v1087_v40 = vmul.f32 1.442695, %v1085_v39  ;;  %v1089_v41 = vmul.f32 1.442695, %v1086_v15 }
0x11b4   : > { %1516 = vpow2.f32 %v1087_v40 }
0x11b5   : > { %1518 = vpow2.f32 %v1089_v41 }
0x11ba   : > { %v1517_v42 = vpop.eup %1516 }
0x11bb   : > { %v1519_v43 = vpop.eup %1518  ;;  %1094 = vperm.xlu2 %1454, %v1517_v42  }
0x11bc   : > { %1097 = vperm.xlu0 %1455, %v1519_v43  }
0x11c3   : > { %1145 = vrot.lane.b32.xlu2 %v1017_v12, %s1559_s25 }
0x1215   : > { %v1095_v44 = vpop.permute.xlu2 %1094 }
0x1216   : > { %v1099_v46 = vperm.slane %v1095_v44, %v1673_v24 }
0x122e   : > { %v1098_v45 = vpop.permute.xlu0 %1097 }
0x122f   : > { %v1100_v48 = vperm.slane %v1098_v45, %v1673_v24 }
0x1231   : > { %v1101_v49 = vsel %vm472_vm2, %v1100_v48, %v1099_v46 }
0x1232   : > { %v1103_v50 = vsel %vm475_vm3, %v1101_v49, 0.0 }
0x1233   : > { %1104 = vadd.xlane.f32.xlu1 %v1103_v50 }
0x12a6   : > { %v1105_v51 = vpop.xlane.xlu1 %1104 }
0x12a7   : > { %1520 = vrcp.f32 %v1105_v51 }
0x12ad   : > { %v1521_v55 = vpop.eup %1520 }
0x12ae   : > { %v1109_v56 = vperm.slane %v1521_v55, 1  ;;  %v1108_v59 = vperm.slane %v1521_v55, 0 }
0x12b0   : > { %v1113_v61 = vmul.f32 %v1519_v43, %v1109_v56  ;;  %v1112_v62 = vmul.f32 %v1517_v42, %v1108_v59 }
0x12b2   : > { %1121 = vperm.xlu0 %1455, %v1113_v61   ;;  %1116 = vperm.xlu1 %1453, %v1112_v62  }
0x1324   : > { %v1122_v63 = vpop.permute.xlu0 %1121  ;;  %v1117_v0 = vpop.permute.xlu1 %1116 }
0x1325   : > { %v1125_v3 = vmul.f32 %v1712_v57, %v1122_v63  ;;  %v1124_v24 = vmul.f32 %v1714_v58, %v1117_v0  ;;  %v1146_v57 = vpop.permute.xlu2 %1145 }
0x1327   : > { %v1133_v1 = vsel %vm525_vm4, %v1125_v3, 0.0  ;;  %v1126_v52 = vsel %vm525_vm4, %v1124_v24, 0.0 }
0x1328   : > { %v1134_v2 = vrot.slane %v1133_v1, 4  ;;  %v1127_v53 = vrot.slane %v1126_v52, 4 }
0x132a   : > { %v1135_v54 = vadd.f32 %v1134_v2, %v1133_v1  ;;  %v1128_v4 = vadd.f32 %v1127_v53, %v1126_v52 }
0x132c   : > { %v1136_v5 = vrot.slane %v1135_v54, 2  ;;  %v1129_v7 = vrot.slane %v1128_v4, 2 }
0x132e   : > { %v1137_v10 = vadd.f32 %v1136_v5, %v1135_v54  ;;  %v1130_v11 = vadd.f32 %v1129_v7, %v1128_v4 }
0x1330   : > { %v1138_v12 = vrot.slane %v1137_v10, 1  ;;  %v1131_v13 = vrot.slane %v1130_v11, 1 }
0x1332   : > { %v1139_v14 = vadd.f32 %v1138_v12, %v1137_v10  ;;  %v1132_v16 = vadd.f32 %v1131_v13, %v1130_v11 }
0x1334   : > { %v1142_v58 = vsel %vm472_vm2, %v1139_v14, %v1132_v16 }
0x1335   : > { %v1148_v30 = vsel %vm525_vm4, %v1142_v58, %v1146_v57 }
0x1336   : > { %v1149_v17 = vpack.c.bf16 %v1148_v30, %v1148_v30 }
0x1338   : > { %1401 = vmatmul.msk.bf16.vlgmr.msra.gmra.mxu3 %vm570_vm5, %v1149_v17 }
0x13bb   : > { %v1165_v20 = vpop.f32.mrf.mxu3 }
0x13bc   : > { %v1166_v21 = vadd.f32 %v1165_v20, %v1152_v19 }
0x13be   : > { %1522 = vtanh.f32 %v1166_v21  ;;  %v1402_v25 = vmul.f32 -1.442695, %v1166_v21 }
0x13c0   : > { %1524 = vpow2.f32 %v1402_v25 }
0x13c3   : > { %v1167_v22 = vpop.f32.mrf.mxu3 }
0x13c4   : > { %v1523_v23 = vpop.eup %1522 }
0x13c5   : > { %1191 = vrot.lane.b32.xlu0 %v1523_v23, %s1558_s18 }
0x13c6   : > { %v1525_v26 = vpop.eup %1524 }
0x13c7   : > { %v1172_v27 = vadd.f32 1.0, %v1525_v26 }
0x13c9   : > { %1526 = vrcp.f32 %v1172_v27  ;;  %v1184_v34 = vand.u32 2147483648, %v1172_v27  ;;  %vm1178_vm3 = vweird.f32 %v1172_v27  ;;  %v1182_v6 = vand.u32 2147483647, %v1172_v27 }
0x13cb   : > { %v1185_v35 = vor.u32 1.1754944e-38, %v1184_v34  ;;  %vm1183_vm5 = vcmp.eq.f32.partialorder %v1182_v6, 8.507059e+37 }
0x13cf   : > { %v1527_v28 = vpop.eup %1526 }
0x13d0   : > { %v1174_v29 = vmul.f32 %v1527_v28, %v1172_v27  ;;  %vm1179_vm2 = vweird.f32 %v1527_v28 }
0x13d1   : > { %vm1180_vm4 = vmor %vm1178_vm3, %vm1179_vm2 }
0x13d2   : > { %v1175_v31 = vsub.f32 1.0, %v1174_v29 }
0x13d4   : > { %v1176_v32 = vmul.f32 %v1527_v28, %v1175_v31 }
0x13d6   : > { %v1177_v33 = vadd.f32 %v1527_v28, %v1176_v32 }
0x13d8   : > { %v1181_v8 = vsel %vm1180_vm4, %v1527_v28, %v1177_v33 }
0x13d9   : > { %v1186_v36 = vsel %vm1183_vm5, %v1185_v35, %v1181_v8 }
0x13da   : > { %v1189_v38 = vmul.f32 %v1186_v36, %v1812_v9 }
0x1437   : > { %v1192_v47 = vpop.permute.xlu0 %1191 }
0x1438   : > { %v1194_v37 = vmul.f32 %v1192_v47, %v1186_v36 }
0x143a   : > { %1196 = vrot.lane.b32.xlu2 %v1194_v37, %s1557_s14 }
0x1494   : > { %v1197_v39 = vpop.permute.xlu2 %1196 }
0x1495   : > { %v1199_v15 = vadd.f32 %v1197_v39, %v1189_v38 }
0x1497   : > { %1528 = vtanh.f32 %v1199_v15 }
0x149d   : > { %v1529_v40 = vpop.eup %1528 }
0x149e   : > { %1202 = vrot.lane.b32.xlu0 %v1529_v40, %s1558_s18 }
0x14a6   : > { %1235 = vrot.lane.b32.xlu0 %v1199_v15, %s1560_s12 }
0x1510   : > { %v1203_v41 = vpop.permute.xlu0 %1202 }
0x1511   : > { %v1205_v42 = vmul.f32 %v1203_v41, %v1186_v36 }
0x1513   : > { %v1206_v43 = vpack.c.bf16 %v1205_v42, %v1205_v42  ;;  %1229 = vrot.lane.b32.xlu2 %v1205_v42, %s1557_s14 }
0x1515   : > { %1208 = vrot.lane.b32.xlu1 %v1206_v43, %s1557_s14 }
0x1518   : > { %v1236_v44 = vpop.permute.xlu0 %1235 }
0x1519   : > { %1238 = vst.msk [vmem:[#allocation3] sm:$0x3] %vm1232_vm7, %v1236_v44 }
0x156d   : > { %v1230_v9 = vpop.permute.xlu2 %1229 }
0x156e   : > { %1233 = vst.msk [vmem:[#allocation2] sm:$0x3] %vm1232_vm7, %v1230_v9 }
0x1587   : > { %v1209_v45 = vpop.permute.xlu1 %1208 }
0x1588   : > { %1403 = vmatmul.msk.bf16.vlgmr.msra.gmra.mxu1 %vm428_vm1, %v1209_v45 }
0x1605   : > { %v1222_v46 = vpop.f32.mrf.mxu1 }
0x1606   : > { %v1223_v48 = vadd.f32 %v1747_v60, %v1222_v46 }
0x1608   : > { %1404 = vst [vmem:[%s1632_s16 + $0x6] sm:$0x3] %v1223_v48 }
0x160d   : > { %v1224_v49 = vpop.f32.mrf.mxu1 }
0x160e PF: > { %s18_s29 = sadd.s32 1, %s1552_s29   ;;  %s1871_s27 = smov %s1548_s28 }
0x160f   : > { %p15_p6 = scmp.ge.s32.totalorder %s18_s29, 4   ;;  %s1872_s28 = smov %s1874_s30 }
0x1611   :  { %17 = sbr.rel (!%p15_p6) target bundleno = 2 (0x2), region = 98 }

</bundles_post_ra>
